<compile_context>
chip_gen: v7x
topology: tpu7x:2x2x1
jax: 0.10.0
libtpu: 0.0.40
codegen_flags: <defaults>
</compile_context>

<pallas_src>
import functools

import jax
import jax.numpy as jnp
from jax import lax
from jax.experimental import pallas as pl
from jax.experimental.pallas import tpu as pltpu

_HP = lax.Precision.HIGHEST


def _round_up(a, b):
    return -(-a // b) * b


def _ann_close_kernel(x_ref, y_ref, wx_ref, wy_ref, bi_ref, wh_ref, bh_ref,
                      wo_ref, bo_ref, out_ref, yt_scr, *, fill_obs):
    """One (ngrid tile, time block) step.

    x_ref  : (TT, nx, TG)    y_ref : (TT, ny, TG)    out_ref : (TT, ny, TG)
    wx_ref : (hidden, nx)    wy_ref: (hidden, ny)    bi_ref  : (hidden, 1)
    wh_ref : (hidden, hidden) bh_ref: (hidden, 1)
    wo_ref : (ny, hidden)    bo_ref: (ny, 1)
    yt_scr : (ny, TG)  -- carried state for this ngrid tile across time blocks
    """
    tb = pl.program_id(1)          # time-block index (innermost, sequential)
    tt = x_ref.shape[0]            # static timesteps per block

    # yt = zeros before the first timestep of each ngrid tile.
    @pl.when(tb == 0)
    def _():
        yt_scr[...] = jnp.zeros_like(yt_scr)

    # Weights stay VMEM-resident across the whole grid (constant index maps).
    wx = wx_ref[...]
    wy = wy_ref[...]
    bi = bi_ref[...]
    wh = wh_ref[...]
    bh = bh_ref[...]
    wo = wo_ref[...]
    bo = bo_ref[...]

    def step(i, yt):
        xt = x_ref[i]                                   # (nx, TG)
        if fill_obs:
            yobs = y_ref[i]                             # (ny, TG)
            # NaN test: fill yt where the observation is present.
            yt = jnp.where(yobs == yobs, yobs, yt)

        # i2h: cat([x_t, y_t]) @ W^T  ==  Wx @ x_t  +  wy * y_t  (ny == 1 outer
        # product on the VPU; avoids a K=1 MXU push/pop) + bias.
        h = jnp.dot(wx, xt, precision=_HP, preferred_element_type=jnp.float32)
        h = h + wy * yt + bi                            # (hidden, TG)
        ht = jnp.maximum(h, 0.0)                        # relu

        # h2h
        ht2 = jnp.dot(wh, ht, precision=_HP,
                      preferred_element_type=jnp.float32) + bh
        # h2o
        yt_new = jnp.dot(wo, ht2, precision=_HP,
                         preferred_element_type=jnp.float32) + bo   # (ny, TG)

        out_ref[i] = yt_new.astype(out_ref.dtype)       # lane-dense VMEM store
        return yt_new

    yt_final = lax.fori_loop(0, tt, step, yt_scr[...], unroll=4)
    yt_scr[...] = yt_final


def ann_close_forward(x, y, params, *, fill_obs=True, tt=None, tg=None):
    """Pallas implementation of AnnCloseModel.forward.

    x: (nt, ngrid, nx) f32
    y: (nt, ngrid, ny) f32 with NaN marking missing observations (or None)
    params (torch.nn.Linear layout, weight = (out, in)):
        w_i2h (hidden, nx+ny), b_i2h (hidden,),
        w_h2h (hidden, hidden), b_h2h (hidden,),
        w_h2o (ny, hidden),     b_h2o (ny,)
    Returns (nt, ngrid, ny) f32.
    """
    nt, ngrid, nx = x.shape
    hidden = params["w_i2h"].shape[0]
    ny = params["w_h2o"].shape[0]
    assert ny == 1, "AnnCloseModel carries yt of width 1 (i2h expects nx+1 inputs)"
    assert params["w_i2h"].shape[1] == nx + ny

    if y is None:
        y = jnp.full((nt, ngrid, ny), jnp.nan, jnp.float32)

    # Tile sizes: lane tile TG (multiple of 128), time batch TT.
    if tg is None:
        tg = min(512, _round_up(ngrid, 128))
    if tt is None:
        tt = max(1, min(32, nt))

    nt_p = _round_up(nt, tt)
    ngrid_p = _round_up(ngrid, tg)
    if (nt_p, ngrid_p) != (nt, ngrid):
        x = jnp.pad(x, ((0, nt_p - nt), (0, ngrid_p - ngrid), (0, 0)))
        y = jnp.pad(y, ((0, nt_p - nt), (0, ngrid_p - ngrid), (0, 0)),
                    constant_values=jnp.nan)

    # Lane-dense layout: ngrid on the lane (last) dimension.
    x_t = jnp.transpose(x, (0, 2, 1)).astype(jnp.float32)   # (nt_p, nx, ngrid_p)
    y_t = jnp.transpose(y, (0, 2, 1)).astype(jnp.float32)   # (nt_p, ny, ngrid_p)

    wx = params["w_i2h"][:, :nx].astype(jnp.float32)         # (hidden, nx)
    wy = params["w_i2h"][:, nx:].astype(jnp.float32)         # (hidden, ny)
    bi = params["b_i2h"].reshape(hidden, 1).astype(jnp.float32)
    wh = params["w_h2h"].astype(jnp.float32)                 # (hidden, hidden)
    bh = params["b_h2h"].reshape(hidden, 1).astype(jnp.float32)
    wo = params["w_h2o"].astype(jnp.float32)                 # (ny, hidden)
    bo = params["b_h2o"].reshape(ny, 1).astype(jnp.float32)

    kernel = functools.partial(_ann_close_kernel, fill_obs=fill_obs)
    const = lambda shape: pl.BlockSpec(shape, lambda g, t: (0, 0))

    out_t = pl.pallas_call(
        kernel,
        out_shape=jax.ShapeDtypeStruct((nt_p, ny, ngrid_p), jnp.float32),
        grid_spec=pltpu.PrefetchScalarGridSpec(
            num_scalar_prefetch=0,
            grid=(ngrid_p // tg, nt_p // tt),          # (parallel, sequential)
            in_specs=[
                pl.BlockSpec((tt, nx, tg), lambda g, t: (t, 0, g)),   # x block
                pl.BlockSpec((tt, ny, tg), lambda g, t: (t, 0, g)),   # y block
                const((hidden, nx)),                                  # Wx
                const((hidden, ny)),                                  # wy
                const((hidden, 1)),                                   # b_i2h
                const((hidden, hidden)),                              # W_h2h
                const((hidden, 1)),                                   # b_h2h
                const((ny, hidden)),                                  # W_h2o
                const((ny, 1)),                                       # b_h2o
            ],
            out_specs=pl.BlockSpec((tt, ny, tg), lambda g, t: (t, 0, g)),
            scratch_shapes=[pltpu.VMEM((ny, tg), jnp.float32)],       # carried y_t
        ),
        compiler_params=pltpu.CompilerParams(
            # ngrid tiles are independent (sharded across cores on v7x);
            # time must stay innermost & sequential for the carried state.
            dimension_semantics=("parallel", "arbitrary")),
    )(x_t, y_t, wx, wy, bi, wh, bh, wo, bo)

    out = jnp.transpose(out_t, (0, 2, 1))       # back to (nt_p, ngrid_p, ny)
    return out[:nt, :ngrid, :]


def ann_close_reference(x, y, params, *, fill_obs=True):
    """Pure-JAX reference matching the PyTorch forward exactly."""
    ngrid = x.shape[1]
    ny = params["w_h2o"].shape[0]

    def step(yt, inp):
        xt, yobs = inp
        if fill_obs:
            yt = jnp.where(yobs == yobs, yobs, yt)
        xcat = jnp.concatenate([xt, yt], axis=1)
        ht = jax.nn.relu(jnp.dot(xcat, params["w_i2h"].T, precision=_HP)
                         + params["b_i2h"])
        ht2 = jnp.dot(ht, params["w_h2h"].T, precision=_HP) + params["b_h2h"]
        yt_new = jnp.dot(ht2, params["w_h2o"].T, precision=_HP) + params["b_h2o"]
        return yt_new, yt_new

    y0 = jnp.zeros((ngrid, ny), jnp.float32)
    _, out = lax.scan(step, y0, (x, y))
    return out


def make_params(key, nx, ny, hidden):
    ks = jax.random.split(key, 6)
    s_i = 1.0 / jnp.sqrt(nx + 1.0)
    s_h = 1.0 / jnp.sqrt(float(hidden))
    return {
        "w_i2h": jax.random.uniform(ks[0], (hidden, nx + ny), jnp.float32, -s_i, s_i),
        "b_i2h": jax.random.uniform(ks[1], (hidden,), jnp.float32, -s_i, s_i),
        "w_h2h": jax.random.uniform(ks[2], (hidden, hidden), jnp.float32, -s_h, s_h),
        "b_h2h": jax.random.uniform(ks[3], (hidden,), jnp.float32, -s_h, s_h),
        "w_h2o": jax.random.uniform(ks[4], (ny, hidden), jnp.float32, -s_h, s_h),
        "b_h2o": jax.random.uniform(ks[5], (ny,), jnp.float32, -s_h, s_h),
    }


if __name__ == "__main__":
    # Small shapes consistent with the module's forward (ny must be 1).
    nt, ngrid, nx, hidden, ny = 16, 256, 4, 32, 1

    key = jax.random.PRNGKey(0)
    k_p, k_x, k_y, k_m = jax.random.split(key, 4)

    params = make_params(k_p, nx, ny, hidden)
    x = jax.random.normal(k_x, (nt, ngrid, nx), jnp.float32)
    y_obs = jax.random.normal(k_y, (nt, ngrid, ny), jnp.float32)
    # Randomly drop ~50% of observations (NaN = missing), exercising the carry path.
    miss = jax.random.bernoulli(k_m, 0.5, (nt, ngrid, ny))
    y_obs = jnp.where(miss, jnp.nan, y_obs)

    # tt=4 / tg=128 -> grid (2, 4): exercises both the parallel ngrid tiling and
    # the carried-state handoff across sequential time blocks.
    out = ann_close_forward(x, y_obs, params, fill_obs=True, tt=4, tg=128)
    out = jax.block_until_ready(out)

    ref = ann_close_reference(x, y_obs, params, fill_obs=True)
    assert out.shape == (nt, ngrid, ny)
    assert jnp.allclose(out, ref, atol=1e-5, rtol=1e-4), "mismatch vs reference"

    print("KERNEL_OK")
</pallas_src>

<mosaic_0001>
module attributes {stable_mosaic.version = 11 : i64} {
  func.func @_ann_close_kernel(%arg0: i32, %arg1: i32, %arg2: memref<4x4x128xf32, #tpu.memory_space<vmem>>, %arg3: memref<4x1x128xf32, #tpu.memory_space<vmem>>, %arg4: memref<32x4xf32, #tpu.memory_space<vmem>>, %arg5: memref<32x1xf32, #tpu.memory_space<vmem>>, %arg6: memref<32x1xf32, #tpu.memory_space<vmem>>, %arg7: memref<32x32xf32, #tpu.memory_space<vmem>>, %arg8: memref<32x1xf32, #tpu.memory_space<vmem>>, %arg9: memref<1x32xf32, #tpu.memory_space<vmem>>, %arg10: memref<1x1xf32, #tpu.memory_space<vmem>>, %arg11: memref<4x1x128xf32, #tpu.memory_space<vmem>>, %arg12: memref<1x128xf32, #tpu.memory_space<vmem>>) attributes {dimension_semantics = [#tpu.dimension_semantics<parallel>, #tpu.dimension_semantics<arbitrary>], iteration_bounds = array<i64: 2, 4>, scalar_prefetch = 0 : i64, scratch_operands = 1 : i64, tpu.core_type = #tpu.core_type<tc>, window_params = [{transform_indices = @transform_0, window_bounds = array<i64: 4, 4, 128>}, {transform_indices = @transform_1, window_bounds = array<i64: 4, 1, 128>}, {pipeline_mode = #tpu.pipeline_mode<synchronous>, transform_indices = @transform_2, window_bounds = array<i64: 32, 4>}, {pipeline_mode = #tpu.pipeline_mode<synchronous>, transform_indices = @transform_3, window_bounds = array<i64: 32, 1>}, {pipeline_mode = #tpu.pipeline_mode<synchronous>, transform_indices = @transform_4, window_bounds = array<i64: 32, 1>}, {pipeline_mode = #tpu.pipeline_mode<synchronous>, transform_indices = @transform_5, window_bounds = array<i64: 32, 32>}, {pipeline_mode = #tpu.pipeline_mode<synchronous>, transform_indices = @transform_6, window_bounds = array<i64: 32, 1>}, {pipeline_mode = #tpu.pipeline_mode<synchronous>, transform_indices = @transform_7, window_bounds = array<i64: 1, 32>}, {pipeline_mode = #tpu.pipeline_mode<synchronous>, transform_indices = @transform_8, window_bounds = array<i64: 1, 1>}, {transform_indices = @transform_9, window_bounds = array<i64: 4, 1, 128>}]} {
    %c0_i32 = arith.constant 0 : i32
    %0 = arith.cmpi eq, %arg1, %c0_i32 : i32
    %1 = arith.extui %0 : i1 to i32
    %c0_i32_0 = arith.constant 0 : i32
    %2 = arith.cmpi ne, %1, %c0_i32_0 : i32
    scf.if %2 {
      %cst_58 = arith.constant 0.000000e+00 : f32
      %120 = vector.broadcast %cst_58 : f32 to vector<1x128xf32>
      %c0_59 = arith.constant 0 : index
      %c0_60 = arith.constant 0 : index
      %121 = vector.load %arg12[%c0_59, %c0_60] : memref<1x128xf32, #tpu.memory_space<vmem>>, vector<1x128xf32>
      tpu.vector_store %arg12[%c0_59, %c0_60], %120 {strides = array<i32>} : memref<1x128xf32, #tpu.memory_space<vmem>>, vector<1x128xf32>,
    } else {
    }
    %c0 = arith.constant 0 : index
    %c0_1 = arith.constant 0 : index
    %3 = vector.load %arg4[%c0, %c0_1] : memref<32x4xf32, #tpu.memory_space<vmem>>, vector<32x4xf32>
    %c0_2 = arith.constant 0 : index
    %c0_3 = arith.constant 0 : index
    %4 = vector.load %arg5[%c0_2, %c0_3] : memref<32x1xf32, #tpu.memory_space<vmem>>, vector<32x1xf32>
    %c0_4 = arith.constant 0 : index
    %c0_5 = arith.constant 0 : index
    %5 = vector.load %arg6[%c0_4, %c0_5] : memref<32x1xf32, #tpu.memory_space<vmem>>, vector<32x1xf32>
    %c0_6 = arith.constant 0 : index
    %c0_7 = arith.constant 0 : index
    %6 = vector.load %arg7[%c0_6, %c0_7] : memref<32x32xf32, #tpu.memory_space<vmem>>, vector<32x32xf32>
    %c0_8 = arith.constant 0 : index
    %c0_9 = arith.constant 0 : index
    %7 = vector.load %arg8[%c0_8, %c0_9] : memref<32x1xf32, #tpu.memory_space<vmem>>, vector<32x1xf32>
    %c0_10 = arith.constant 0 : index
    %c0_11 = arith.constant 0 : index
    %8 = vector.load %arg9[%c0_10, %c0_11] : memref<1x32xf32, #tpu.memory_space<vmem>>, vector<1x32xf32>
    %c0_12 = arith.constant 0 : index
    %c0_13 = arith.constant 0 : index
    %9 = vector.load %arg10[%c0_12, %c0_13] : memref<1x1xf32, #tpu.memory_space<vmem>>, vector<1x1xf32>
    %c0_14 = arith.constant 0 : index
    %c0_15 = arith.constant 0 : index
    %10 = vector.load %arg12[%c0_14, %c0_15] : memref<1x128xf32, #tpu.memory_space<vmem>>, vector<1x128xf32>
    %c0_i32_16 = arith.constant 0 : i32
    %11 = arith.index_cast %c0_i32_16 : i32 to index
    %c0_17 = arith.constant 0 : index
    %c0_18 = arith.constant 0 : index
    %12 = vector.load %arg2[%11, %c0_17, %c0_18] : memref<4x4x128xf32, #tpu.memory_space<vmem>>, vector<1x4x128xf32>
    %13 = vector.shape_cast %12 : vector<1x4x128xf32> to vector<4x128xf32>
    %14 = arith.index_cast %c0_i32_16 : i32 to index
    %c0_19 = arith.constant 0 : index
    %c0_20 = arith.constant 0 : index
    %15 = vector.load %arg3[%14, %c0_19, %c0_20] : memref<4x1x128xf32, #tpu.memory_space<vmem>>, vector<1x1x128xf32>
    %16 = vector.shape_cast %15 : vector<1x1x128xf32> to vector<1x128xf32>
    %17 = arith.cmpf oeq, %16, %16 : vector<1x128xf32>
    %18 = arith.select %17, %16, %10 : vector<1x128xi1>, vector<1x128xf32>
    %cst = arith.constant dense<0.000000e+00> : vector<32x128xf32>
    %19 = tpu.matmul %3, %13, %cst {dimension_numbers = #tpu.dot_dimension_numbers<[1], [0], [0], [1], [0, 0, 1, 1], [], []>, precision = #tpu.contract_precision<fp32>} : vector<32x4xf32>, vector<4x128xf32>, vector<32x128xf32> -> vector<32x128xf32>
    %20 = vector.broadcast %4 : vector<32x1xf32> to vector<32x128xf32>
    %21 = vector.broadcast %18 : vector<1x128xf32> to vector<32x128xf32>
    %22 = arith.mulf %20, %21 : vector<32x128xf32>
    %23 = arith.addf %19, %22 : vector<32x128xf32>
    %24 = vector.broadcast %5 : vector<32x1xf32> to vector<32x128xf32>
    %25 = arith.addf %23, %24 : vector<32x128xf32>
    %cst_21 = arith.constant 0.000000e+00 : f32
    %26 = vector.broadcast %cst_21 : f32 to vector<32x128xf32>
    %27 = arith.maximumf %25, %26 : vector<32x128xf32>
    %cst_22 = arith.constant dense<0.000000e+00> : vector<32x128xf32>
    %28 = tpu.matmul %6, %27, %cst_22 {dimension_numbers = #tpu.dot_dimension_numbers<[1], [0], [0], [1], [0, 0, 1, 1], [], []>, precision = #tpu.contract_precision<fp32>} : vector<32x32xf32>, vector<32x128xf32>, vector<32x128xf32> -> vector<32x128xf32>
    %29 = vector.broadcast %7 : vector<32x1xf32> to vector<32x128xf32>
    %30 = arith.addf %28, %29 : vector<32x128xf32>
    %cst_23 = arith.constant dense<0.000000e+00> : vector<1x128xf32>
    %31 = tpu.matmul %8, %30, %cst_23 {dimension_numbers = #tpu.dot_dimension_numbers<[1], [0], [0], [1], [0, 0, 1, 1], [], []>, precision = #tpu.contract_precision<fp32>} : vector<1x32xf32>, vector<32x128xf32>, vector<1x128xf32> -> vector<1x128xf32>
    %32 = vector.broadcast %9 : vector<1x1xf32> to vector<1x128xf32>
    %33 = arith.addf %31, %32 : vector<1x128xf32>
    %34 = arith.index_cast %c0_i32_16 : i32 to index
    %c0_24 = arith.constant 0 : index
    %c0_25 = arith.constant 0 : index
    %35 = vector.load %arg11[%34, %c0_24, %c0_25] : memref<4x1x128xf32, #tpu.memory_space<vmem>>, vector<1x1x128xf32>
    %36 = vector.shape_cast %35 : vector<1x1x128xf32> to vector<1x128xf32>
    %37 = vector.shape_cast %33 : vector<1x128xf32> to vector<1x1x128xf32>
    tpu.vector_store %arg11[%34, %c0_24, %c0_25], %37 {strides = array<i32>} : memref<4x1x128xf32, #tpu.memory_space<vmem>>, vector<1x1x128xf32>,
    %c1_i32 = arith.constant 1 : i32
    %38 = arith.index_cast %c1_i32 : i32 to index
    %c0_26 = arith.constant 0 : index
    %c0_27 = arith.constant 0 : index
    %39 = vector.load %arg2[%38, %c0_26, %c0_27] : memref<4x4x128xf32, #tpu.memory_space<vmem>>, vector<1x4x128xf32>
    %40 = vector.shape_cast %39 : vector<1x4x128xf32> to vector<4x128xf32>
    %41 = arith.index_cast %c1_i32 : i32 to index
    %c0_28 = arith.constant 0 : index
    %c0_29 = arith.constant 0 : index
    %42 = vector.load %arg3[%41, %c0_28, %c0_29] : memref<4x1x128xf32, #tpu.memory_space<vmem>>, vector<1x1x128xf32>
    %43 = vector.shape_cast %42 : vector<1x1x128xf32> to vector<1x128xf32>
    %44 = arith.cmpf oeq, %43, %43 : vector<1x128xf32>
    %45 = arith.select %44, %43, %33 : vector<1x128xi1>, vector<1x128xf32>
    %cst_30 = arith.constant dense<0.000000e+00> : vector<32x128xf32>
    %46 = tpu.matmul %3, %40, %cst_30 {dimension_numbers = #tpu.dot_dimension_numbers<[1], [0], [0], [1], [0, 0, 1, 1], [], []>, precision = #tpu.contract_precision<fp32>} : vector<32x4xf32>, vector<4x128xf32>, vector<32x128xf32> -> vector<32x128xf32>
    %47 = vector.broadcast %4 : vector<32x1xf32> to vector<32x128xf32>
    %48 = vector.broadcast %45 : vector<1x128xf32> to vector<32x128xf32>
    %49 = arith.mulf %47, %48 : vector<32x128xf32>
    %50 = arith.addf %46, %49 : vector<32x128xf32>
    %51 = vector.broadcast %5 : vector<32x1xf32> to vector<32x128xf32>
    %52 = arith.addf %50, %51 : vector<32x128xf32>
    %cst_31 = arith.constant 0.000000e+00 : f32
    %53 = vector.broadcast %cst_31 : f32 to vector<32x128xf32>
    %54 = arith.maximumf %52, %53 : vector<32x128xf32>
    %cst_32 = arith.constant dense<0.000000e+00> : vector<32x128xf32>
    %55 = tpu.matmul %6, %54, %cst_32 {dimension_numbers = #tpu.dot_dimension_numbers<[1], [0], [0], [1], [0, 0, 1, 1], [], []>, precision = #tpu.contract_precision<fp32>} : vector<32x32xf32>, vector<32x128xf32>, vector<32x128xf32> -> vector<32x128xf32>
    %56 = vector.broadcast %7 : vector<32x1xf32> to vector<32x128xf32>
    %57 = arith.addf %55, %56 : vector<32x128xf32>
    %cst_33 = arith.constant dense<0.000000e+00> : vector<1x128xf32>
    %58 = tpu.matmul %8, %57, %cst_33 {dimension_numbers = #tpu.dot_dimension_numbers<[1], [0], [0], [1], [0, 0, 1, 1], [], []>, precision = #tpu.contract_precision<fp32>} : vector<1x32xf32>, vector<32x128xf32>, vector<1x128xf32> -> vector<1x128xf32>
    %59 = vector.broadcast %9 : vector<1x1xf32> to vector<1x128xf32>
    %60 = arith.addf %58, %59 : vector<1x128xf32>
    %61 = arith.index_cast %c1_i32 : i32 to index
    %c0_34 = arith.constant 0 : index
    %c0_35 = arith.constant 0 : index
    %62 = vector.load %arg11[%61, %c0_34, %c0_35] : memref<4x1x128xf32, #tpu.memory_space<vmem>>, vector<1x1x128xf32>
    %63 = vector.shape_cast %62 : vector<1x1x128xf32> to vector<1x128xf32>
    %64 = vector.shape_cast %60 : vector<1x128xf32> to vector<1x1x128xf32>
    tpu.vector_store %arg11[%61, %c0_34, %c0_35], %64 {strides = array<i32>} : memref<4x1x128xf32, #tpu.memory_space<vmem>>, vector<1x1x128xf32>,
    %c2_i32 = arith.constant 2 : i32
    %65 = arith.index_cast %c2_i32 : i32 to index
    %c0_36 = arith.constant 0 : index
    %c0_37 = arith.constant 0 : index
    %66 = vector.load %arg2[%65, %c0_36, %c0_37] : memref<4x4x128xf32, #tpu.memory_space<vmem>>, vector<1x4x128xf32>
    %67 = vector.shape_cast %66 : vector<1x4x128xf32> to vector<4x128xf32>
    %68 = arith.index_cast %c2_i32 : i32 to index
    %c0_38 = arith.constant 0 : index
    %c0_39 = arith.constant 0 : index
    %69 = vector.load %arg3[%68, %c0_38, %c0_39] : memref<4x1x128xf32, #tpu.memory_space<vmem>>, vector<1x1x128xf32>
    %70 = vector.shape_cast %69 : vector<1x1x128xf32> to vector<1x128xf32>
    %71 = arith.cmpf oeq, %70, %70 : vector<1x128xf32>
    %72 = arith.select %71, %70, %60 : vector<1x128xi1>, vector<1x128xf32>
    %cst_40 = arith.constant dense<0.000000e+00> : vector<32x128xf32>
    %73 = tpu.matmul %3, %67, %cst_40 {dimension_numbers = #tpu.dot_dimension_numbers<[1], [0], [0], [1], [0, 0, 1, 1], [], []>, precision = #tpu.contract_precision<fp32>} : vector<32x4xf32>, vector<4x128xf32>, vector<32x128xf32> -> vector<32x128xf32>
    %74 = vector.broadcast %4 : vector<32x1xf32> to vector<32x128xf32>
    %75 = vector.broadcast %72 : vector<1x128xf32> to vector<32x128xf32>
    %76 = arith.mulf %74, %75 : vector<32x128xf32>
    %77 = arith.addf %73, %76 : vector<32x128xf32>
    %78 = vector.broadcast %5 : vector<32x1xf32> to vector<32x128xf32>
    %79 = arith.addf %77, %78 : vector<32x128xf32>
    %cst_41 = arith.constant 0.000000e+00 : f32
    %80 = vector.broadcast %cst_41 : f32 to vector<32x128xf32>
    %81 = arith.maximumf %79, %80 : vector<32x128xf32>
    %cst_42 = arith.constant dense<0.000000e+00> : vector<32x128xf32>
    %82 = tpu.matmul %6, %81, %cst_42 {dimension_numbers = #tpu.dot_dimension_numbers<[1], [0], [0], [1], [0, 0, 1, 1], [], []>, precision = #tpu.contract_precision<fp32>} : vector<32x32xf32>, vector<32x128xf32>, vector<32x128xf32> -> vector<32x128xf32>
    %83 = vector.broadcast %7 : vector<32x1xf32> to vector<32x128xf32>
    %84 = arith.addf %82, %83 : vector<32x128xf32>
    %cst_43 = arith.constant dense<0.000000e+00> : vector<1x128xf32>
    %85 = tpu.matmul %8, %84, %cst_43 {dimension_numbers = #tpu.dot_dimension_numbers<[1], [0], [0], [1], [0, 0, 1, 1], [], []>, precision = #tpu.contract_precision<fp32>} : vector<1x32xf32>, vector<32x128xf32>, vector<1x128xf32> -> vector<1x128xf32>
    %86 = vector.broadcast %9 : vector<1x1xf32> to vector<1x128xf32>
    %87 = arith.addf %85, %86 : vector<1x128xf32>
    %88 = arith.index_cast %c2_i32 : i32 to index
    %c0_44 = arith.constant 0 : index
    %c0_45 = arith.constant 0 : index
    %89 = vector.load %arg11[%88, %c0_44, %c0_45] : memref<4x1x128xf32, #tpu.memory_space<vmem>>, vector<1x1x128xf32>
    %90 = vector.shape_cast %89 : vector<1x1x128xf32> to vector<1x128xf32>
    %91 = vector.shape_cast %87 : vector<1x128xf32> to vector<1x1x128xf32>
    tpu.vector_store %arg11[%88, %c0_44, %c0_45], %91 {strides = array<i32>} : memref<4x1x128xf32, #tpu.memory_space<vmem>>, vector<1x1x128xf32>,
    %c3_i32 = arith.constant 3 : i32
    %92 = arith.index_cast %c3_i32 : i32 to index
    %c0_46 = arith.constant 0 : index
    %c0_47 = arith.constant 0 : index
    %93 = vector.load %arg2[%92, %c0_46, %c0_47] : memref<4x4x128xf32, #tpu.memory_space<vmem>>, vector<1x4x128xf32>
    %94 = vector.shape_cast %93 : vector<1x4x128xf32> to vector<4x128xf32>
    %95 = arith.index_cast %c3_i32 : i32 to index
    %c0_48 = arith.constant 0 : index
    %c0_49 = arith.constant 0 : index
    %96 = vector.load %arg3[%95, %c0_48, %c0_49] : memref<4x1x128xf32, #tpu.memory_space<vmem>>, vector<1x1x128xf32>
    %97 = vector.shape_cast %96 : vector<1x1x128xf32> to vector<1x128xf32>
    %98 = arith.cmpf oeq, %97, %97 : vector<1x128xf32>
    %99 = arith.select %98, %97, %87 : vector<1x128xi1>, vector<1x128xf32>
    %cst_50 = arith.constant dense<0.000000e+00> : vector<32x128xf32>
    %100 = tpu.matmul %3, %94, %cst_50 {dimension_numbers = #tpu.dot_dimension_numbers<[1], [0], [0], [1], [0, 0, 1, 1], [], []>, precision = #tpu.contract_precision<fp32>} : vector<32x4xf32>, vector<4x128xf32>, vector<32x128xf32> -> vector<32x128xf32>
    %101 = vector.broadcast %4 : vector<32x1xf32> to vector<32x128xf32>
    %102 = vector.broadcast %99 : vector<1x128xf32> to vector<32x128xf32>
    %103 = arith.mulf %101, %102 : vector<32x128xf32>
    %104 = arith.addf %100, %103 : vector<32x128xf32>
    %105 = vector.broadcast %5 : vector<32x1xf32> to vector<32x128xf32>
    %106 = arith.addf %104, %105 : vector<32x128xf32>
    %cst_51 = arith.constant 0.000000e+00 : f32
    %107 = vector.broadcast %cst_51 : f32 to vector<32x128xf32>
    %108 = arith.maximumf %106, %107 : vector<32x128xf32>
    %cst_52 = arith.constant dense<0.000000e+00> : vector<32x128xf32>
    %109 = tpu.matmul %6, %108, %cst_52 {dimension_numbers = #tpu.dot_dimension_numbers<[1], [0], [0], [1], [0, 0, 1, 1], [], []>, precision = #tpu.contract_precision<fp32>} : vector<32x32xf32>, vector<32x128xf32>, vector<32x128xf32> -> vector<32x128xf32>
    %110 = vector.broadcast %7 : vector<32x1xf32> to vector<32x128xf32>
    %111 = arith.addf %109, %110 : vector<32x128xf32>
    %cst_53 = arith.constant dense<0.000000e+00> : vector<1x128xf32>
    %112 = tpu.matmul %8, %111, %cst_53 {dimension_numbers = #tpu.dot_dimension_numbers<[1], [0], [0], [1], [0, 0, 1, 1], [], []>, precision = #tpu.contract_precision<fp32>} : vector<1x32xf32>, vector<32x128xf32>, vector<1x128xf32> -> vector<1x128xf32>
    %113 = vector.broadcast %9 : vector<1x1xf32> to vector<1x128xf32>
    %114 = arith.addf %112, %113 : vector<1x128xf32>
    %115 = arith.index_cast %c3_i32 : i32 to index
    %c0_54 = arith.constant 0 : index
    %c0_55 = arith.constant 0 : index
    %116 = vector.load %arg11[%115, %c0_54, %c0_55] : memref<4x1x128xf32, #tpu.memory_space<vmem>>, vector<1x1x128xf32>
    %117 = vector.shape_cast %116 : vector<1x1x128xf32> to vector<1x128xf32>
    %118 = vector.shape_cast %114 : vector<1x128xf32> to vector<1x1x128xf32>
    tpu.vector_store %arg11[%115, %c0_54, %c0_55], %118 {strides = array<i32>} : memref<4x1x128xf32, #tpu.memory_space<vmem>>, vector<1x1x128xf32>,
    %c4_i32 = arith.constant 4 : i32
    %c0_56 = arith.constant 0 : index
    %c0_57 = arith.constant 0 : index
    %119 = vector.load %arg12[%c0_56, %c0_57] : memref<1x128xf32, #tpu.memory_space<vmem>>, vector<1x128xf32>
    tpu.vector_store %arg12[%c0_56, %c0_57], %114 {strides = array<i32>} : memref<1x128xf32, #tpu.memory_space<vmem>>, vector<1x128xf32>,
    return
  }
  func.func @transform_0(%arg0: i32, %arg1: i32) -> (i32, i32, i32) {
    %c0_i32 = arith.constant 0 : i32
    %c0_i32_0 = arith.constant 0 : i32
    return %arg1, %c0_i32, %arg0 : i32, i32, i32
  }
  func.func @transform_1(%arg0: i32, %arg1: i32) -> (i32, i32, i32) {
    %c0_i32 = arith.constant 0 : i32
    %c0_i32_0 = arith.constant 0 : i32
    return %arg1, %c0_i32, %arg0 : i32, i32, i32
  }
  func.func @transform_2(%arg0: i32, %arg1: i32) -> (i32, i32) {
    %c0_i32 = arith.constant 0 : i32
    %c0_i32_0 = arith.constant 0 : i32
    %c0_i32_1 = arith.constant 0 : i32
    return %c0_i32, %c0_i32_0 : i32, i32
  }
  func.func @transform_3(%arg0: i32, %arg1: i32) -> (i32, i32) {
    %c0_i32 = arith.constant 0 : i32
    %c0_i32_0 = arith.constant 0 : i32
    %c0_i32_1 = arith.constant 0 : i32
    return %c0_i32, %c0_i32_0 : i32, i32
  }
  func.func @transform_4(%arg0: i32, %arg1: i32) -> (i32, i32) {
    %c0_i32 = arith.constant 0 : i32
    %c0_i32_0 = arith.constant 0 : i32
    %c0_i32_1 = arith.constant 0 : i32
    return %c0_i32, %c0_i32_0 : i32, i32
  }
  func.func @transform_5(%arg0: i32, %arg1: i32) -> (i32, i32) {
    %c0_i32 = arith.constant 0 : i32
    %c0_i32_0 = arith.constant 0 : i32
    %c0_i32_1 = arith.constant 0 : i32
    return %c0_i32, %c0_i32_0 : i32, i32
  }
  func.func @transform_6(%arg0: i32, %arg1: i32) -> (i32, i32) {
    %c0_i32 = arith.constant 0 : i32
    %c0_i32_0 = arith.constant 0 : i32
    %c0_i32_1 = arith.constant 0 : i32
    return %c0_i32, %c0_i32_0 : i32, i32
  }
  func.func @transform_7(%arg0: i32, %arg1: i32) -> (i32, i32) {
    %c0_i32 = arith.constant 0 : i32
    %c0_i32_0 = arith.constant 0 : i32
    %c0_i32_1 = arith.constant 0 : i32
    return %c0_i32, %c0_i32_0 : i32, i32
  }
  func.func @transform_8(%arg0: i32, %arg1: i32) -> (i32, i32) {
    %c0_i32 = arith.constant 0 : i32
    %c0_i32_0 = arith.constant 0 : i32
    %c0_i32_1 = arith.constant 0 : i32
    return %c0_i32, %c0_i32_0 : i32, i32
  }
  func.func @transform_9(%arg0: i32, %arg1: i32) -> (i32, i32, i32) {
    %c0_i32 = arith.constant 0 : i32
    %c0_i32_0 = arith.constant 0 : i32
    return %arg1, %c0_i32, %arg0 : i32, i32, i32
  }
}

</mosaic_0001>

<bundles_post_ra>
// kernel: tpu_custom_call.1
= control target key start
LH: loop header
LB: loop body
LE: loop exit
PB: predicated region body
PF: predicated region fallthrough
CT: control target
= control target key end

     0   :  { %s10587_s0 = inlined_call_operand.vmem [shape: f32[16,4,256], index: 0, kind: input, shape index: {}]   ;;  %s10588_s1 = inlined_call_operand.hbm [shape: f32[16,1,256], index: 1, kind: input, shape index: {}]   ;;  %s10589_s2 = inlined_call_operand.vmem [shape: f32[32,4], index: 2, kind: input, shape index: {}]   ;;  %s10590_s3 = inlined_call_operand.vmem [shape: f32[32,1], index: 3, kind: input, shape index: {}]   ;;  %s10591_s4 = inlined_call_operand.vmem [shape: f32[32,1], index: 4, kind: input, shape index: {}]   ;;  %s10592_s5 = inlined_call_operand.hbm [shape: f32[32,32], index: 5, kind: input, shape index: {}]   ;;  %s10593_s6 = inlined_call_operand.vmem [shape: f32[32,1], index: 6, kind: input, shape index: {}]   ;;  %s10594_s7 = inlined_call_operand.vmem [shape: f32[1,32], index: 7, kind: input, shape index: {}]   ;;  %s10595_s8 = inlined_call_operand.<no memory space> [shape: f32[1,1], index: 8, kind: input, shape index: {}]   ;;  %s10596_s9 = inlined_call_operand.hbm [shape: f32[16,1,256], index: 9, kind: output, shape index: {}]  }
   0x1   :  { %10639 = sst [smem:[#allocation34_spill]] %s10596_s9  ;;  %v14_v0 = vstv %s10595_s8 }
   0x2   :  { %15 = vst [vmem:[#allocation3] sm:$0x1] %v14_v0 }
   0x3   :  { %16 = vsyncpa [#allocation6], 0 }
   0x4   :  { %18 = vsyncpa [#allocation6 + $0x1], 0 }
   0x5   :  { %19 = vsyncpa [#allocation9], 0 }
   0x6   :  { %20 = vsyncpa [#allocation7], 0 }
   0x7   :  { %22 = vsyncpa [#allocation7 + $0x1], 0  ;;  %s9699_s11 = smov 0   ;;  %s9701_s12 = smov 0  }
   0x8   :  { %s9703_s13 = smov 0   ;;  %s9705_s14 = smov 0  }
   0x9   :  { %s9707_s15 = smov 0   ;;  %s9709_s16 = smov 0  }
   0xa   :  { %s9711_s17 = smov 0   ;;  %s9713_s8 = smov 0  }
   0xb LB: > { %10640 = sst [smem:[#allocation14_spill]] %s9600_s11  ;;  %s7538_s18 = sadd.s32 4294967295, %s9628_s8   ;;  %s9628_s8 = sphi %s9713_s8, %s28_s8   ;;  %s9624_s17 = sphi %s9711_s17, %s10714_s17   ;;  %s9620_s16 = sphi %s9709_s16, %s10713_s16   ;;  %s9616_s15 = sphi %s9707_s15, %s10712_s15   ;;  %s9612_s14 = sphi %s9705_s14, %s10711_s14   ;;  %s9608_s13 = sphi %s9703_s13, %s10710_s13   ;;  %s9604_s12 = sphi %s9701_s12, %s10709_s12   ;;  %s9600_s11 = sphi %s9699_s11, %s10708_s11  }
   0xc   : > { %10641 = sst [smem:[#allocation15_spill]] %s9616_s15  ;;  %s7539_s19 = sadd.s32 4294967294, %s9628_s8  }
   0xd   : > { %s37_s20 = sadd.s32 1, %s9620_s16  ;;  %s40_s21 = sadd.s32 1, %s9624_s17 }
   0xe   : > { %p38_p0 = scmp.ge.s32.totalorder %s37_s20, 4  ;;  %s49_s22 = sadd.s32 1, %s9608_s13 }
   0xf   : > { %p56_p1 = scmp.ne.s32.totalorder %s9608_s13, %s9604_s12  ;;  %p57_p2 = scmp.eq.s32.totalorder %s9628_s8, 0 }
  0x10   : > { %s10716_s20 = smov (%p38_p0, %s37_s20), 0  ;;  %s10718_s21 = smov (!%p38_p0, %s40_s21), %s9624_s17 }
  0x11   : > { %10642 = sst [smem:[#allocation16_spill]] %s10716_s20  ;;  %s44_s23 = ssub.s32 %s9620_s16, %s10716_s20 }
  0x12   : > { %p9752_p3 = por %p57_p2, %p56_p1  ;;  %p42_p4 = scmp.ge.s32.totalorder %s10718_s21, 2 }
  0x13   : > { %p90_p5 = scmp.ne.s32.totalorder %s9604_s12, %s9600_s11  ;;  %p9758_p6 = scmp.eq.s32.totalorder %s7538_s18, 0 }
  0x14   : > { %s10643_s24 = scalar_select %p9752_p3, 1, 0 }
  0x15   : > { %s10644_s25 = scalar_select %p9758_p6, 1, 0 }
  0x16   : > { %p263_p7 = scmp.eq.s32.totalorder %s7538_s18, 7  ;;  %s10720_s21 = smov (%p42_p4, %s10718_s21), 0 }
  0x17   : > { %10645 = sst [smem:[#allocation17_spill]] %s10720_s21  ;;  %p9766_p8 = por %p9758_p6, %p90_p5 }
  0x18   : > { %p9770_p9 = por %p263_p7, %p56_p1  ;;  %s45_s28 = ssub.s32 %s9624_s17, %s10720_s21 }
  0x19   : > { %s10646_s26 = scalar_select %p9766_p8, 1, 0 }
  0x1a   : > { %s10647_s27 = scalar_select %p9770_p9, 1, 0 }
  0x1b   : > { %p269_p10 = scmp.eq.s32.totalorder %s7539_s19, 7  ;;  %s46_s29 = sor.u32 %s45_s28, %s44_s23 }
  0x1c   : > { %10648 = sst [smem:[#allocation18_spill]] %s10647_s27  ;;  %p7540_p11 = scmp.ge.s32.totalorder %s9628_s8, 1 }
  0x1d   : > { %p47_p12 = scmp.eq.s32.totalorder %s46_s29, 0  ;;  %p9777_p13 = por %p269_p10, %p90_p5 }
  0x1e   : > { %p276_p0 = scmp.lt.s32.totalorder %s9628_s8, 9  ;;  %s9630_s20 = smov [#allocation8]  }
  0x1f   : > { %s10649_s30 = scalar_select %p9777_p13, 1, 0 }
  0x20   : > { %s9783_s10 = scalar_select %p47_p12, %s9608_s13, %s49_s22  }
  0x21   : > { %10650 = sst [smem:[#allocation19_spill]] %s10649_s30  ;;  %p9785_p2 = pnand %p7540_p11, %p276_p0 }
  0x22   : > { %10651 = sst [smem:[#allocation20_spill]] %s9783_s10  ;;  %s297_s11 = sshll.u32 %s9630_s20, 4  ;;  %s298_s11 = int_to_ptr.vmem [resolvable:$true] %s297_s11 }
  0x23   : > { %s10652_s18 = scalar_select %p9785_p2, 1, 0 }
  0x24   : > { %p9379_p1 = pneg %p9785_p2  ;;  %s9470_s22 = scalar_lea.hbm %s10592_s5, 512 }
  0x25   : > { %p9471_p5 = scmp.ne.s32.totalorder %s10592_s5, %s9470_s22  ;;  %p9477_p12 = scmp.lt.u32.totalorder %s9470_s22, %s10592_s5 }
  0x26   : > { %p9793_p4 = pnand %p9379_p1, %p9758_p6 }
  0x28   : > { %p9472_p7 = pneg %p9793_p4 }
  0x2a   : > { %p9473_p10 = pnand %p9472_p7, %p9471_p5 }
  0x2c   : > { %p9474_p11 = pneg %p9473_p10 }
  0x2e   : > { %p9479_p0 = pnand %p9477_p12, %p9474_p11 }
  0x30   : > { %9482 = shalt.err (!%p9479_p0)
}
  0x31   : > { %s9483_s30 = scalar_lea.vmem %s298_s11, 512  ;;  %p9491_p6 = scmp.lt.s32.totalorder %s298_s11, %s298_s11 }
  0x32   : > { %p9484_p1 = scmp.ne.s32.totalorder %s298_s11, %s9483_s30  ;;  %p9492_p8 = scmp.lt.s32.totalorder %s9483_s30, %s9483_s30 }
  0x34   : > { %p9486_p13 = pnand %p9484_p1, %p9472_p7  ;;  %p9493_p2 = por %p9492_p8, %p9491_p6 }
  0x36   : > { %p9487_p9 = pneg %p9486_p13 }
  0x38   : > { %p9494_p3 = pnand %p9493_p2, %p9487_p9 }
  0x3a   : > { %9497 = shalt.err (!%p9494_p3)
}
  0x3b   : > { %s9631_s21 = smov 128   ;;  %s9632_s23 = smov 8  }
  0x3c   : > { %9382 = dma.hbm_to_vmem [thread:$0]  (!%p9793_p4), %s10592_s5, 512, %s298_s11, [#allocation9], %s9631_s21, %s9631_s21, %s9632_s23  }
  0x3d   : > { %p7542_p5 = scmp.ge.s32.totalorder %s9628_s8, 8 }
  0x3e   : > { %p10654_p10 = scmp.ne.s32.totalorder (!%p7542_p5), %s10643_s24, 0 }
  0x3f   : > { %316 = sbr.rel (%p7542_p5) target bundleno = 107 (0x6b), region = 44 }
  0x46   : > { %319 = sbr.rel (!%p10654_p10) target bundleno = 78 (0x4e), region = 48  ;;  %s321_s30 = sand.u32 (%p10654_p10), 1, %s9608_s13  }
  0x47   : > { %s7572_s10 = sshll.u32 (%p10654_p10), %s9620_s16, 3  ;;  %s7543_s22 = sshll.u32 (%p10654_p10), %s321_s30, 4 }
  0x48   : > { %s326_s20 = sadd.s32 (%p10654_p10), %s9624_s17, %s7572_s10  ;;  %s323_s11 = scalar_lea.vmem (%p10654_p10), [#allocation4], %s7543_s22 }
  0x49   : > { %s7546_s9 = sshll.u32 (%p10654_p10), %s326_s20, 2 }
  0x4a   : > { %s328_s15 = scalar_lea.vmem (%p10654_p10), %s10587_s0, %s7546_s9 }
  0x4b   : > { %v344_v1 = vld [vmem:[%s328_s15] sm:$0xf] (%p10654_p10)  ;;  %v346_v2 = vld [vmem:[%s328_s15 + $0x8] sm:$0xf] (%p10654_p10)  ;;  %v348_v3 = vld [vmem:[%s328_s15 + $0x10] sm:$0xf] (%p10654_p10) }
  0x4c   : > { %345 = vst [vmem:[%s323_s11] sm:$0xf] (%p10654_p10), %v344_v1  ;;  %347 = vst [vmem:[%s323_s11 + $0x4] sm:$0xf] (%p10654_p10), %v346_v2  ;;  %v350_v4 = vld [vmem:[%s328_s15 + $0x18] sm:$0xf] (%p10654_p10) }
  0x4d   : > { %349 = vst [vmem:[%s323_s11 + $0x8] sm:$0xf] %v348_v3  ;;  %351 = vst [vmem:[%s323_s11 + $0xc] sm:$0xf] %v350_v4 }
  0x4e PF: > { %s383_s21 = sand.u32 1, %s9608_s13   ;;  %s7573_s23 = sshll.u32 %s9620_s16, 3 }
  0x4f   : > { %s7547_s28 = sshll.u32 %s383_s21, 2  ;;  %s393_s29 = sadd.s32 %s9624_s17, %s7573_s23 }
  0x50   : > { %s7550_s27 = sshll.u32 %s393_s29, 4  ;;  %s387_s9 = scalar_lea.vmem [#allocation5], %s7547_s28 }
  0x51   : > { %s396_s30 = sshll.u32 %s387_s9, 4  ;;  %s9828_s22 = scalar_lea.hbm %s10588_s1, %s7550_s27  ;;  %s9830_s30 = int_to_ptr.vmem [resolvable:$true] %s396_s30 }
  0x52   : > { %s9832_s15 = scalar_lea.sflag [#allocation6], %s383_s21  ;;  %s9498_s19 = scalar_lea.hbm %s9828_s22, 64 }
  0x53   : > { %p9499_p3 = scmp.ne.s32.totalorder %s9828_s22, %s9498_s19  ;;  %p10655_p6 = scmp.ne.s32.totalorder %s10643_s24, 0 }
  0x54   : > { %s9502_s28 = scalar_lea.hbm %s10588_s1, 512  ;;  %p9503_p13 = scmp.lt.u32.totalorder %s9828_s22, %s10588_s1 }
  0x55   : > { %p9500_p8 = pnand %p9499_p3, %p10655_p6  ;;  %p9504_p2 = scmp.lt.u32.totalorder %s9502_s28, %s9498_s19 }
  0x56   : > { %p9506_p7 = scmp.lt.u32.totalorder %s9498_s19, %s9828_s22 }
  0x57   : > { %p9501_p9 = pneg %p9500_p8  ;;  %p9505_p4 = por %p9504_p2, %p9503_p13 }
  0x59   : > { %p9507_p11 = por %p9506_p7, %p9505_p4 }
  0x5b   : > { %p9508_p12 = pnand %p9507_p11, %p9501_p9 }
  0x5d   : > { %9511 = shalt.err (!%p9508_p12)
}
  0x5e   : > { %s9512_s21 = scalar_lea.vmem %s9830_s30, 64  ;;  %s9633_s9 = smov [#allocation5]  }
  0x5f   : > { %p9513_p0 = scmp.ne.s32.totalorder %s9830_s30, %s9512_s21  ;;  %s9516_s10 = sshll.u32 %s9633_s9, 4  ;;  %s9517_s10 = int_to_ptr.vmem [resolvable:$false] %s9516_s10 }
  0x60   : > { %s9518_s20 = scalar_lea.vmem %s9517_s10, 128  ;;  %p9519_p10 = scmp.lt.s32.totalorder %s9830_s30, %s9517_s10 }
  0x61   : > { %p9514_p1 = pnand %p9513_p0, %p10655_p6  ;;  %p9520_p3 = scmp.lt.s32.totalorder %s9518_s20, %s9512_s21 }
  0x63   : > { %p9515_p5 = pneg %p9514_p1  ;;  %p9521_p8 = por %p9520_p3, %p9519_p10 }
  0x65   : > { %p9522_p13 = pnand %p9521_p8, %p9515_p5 }
  0x67   : > { %9525 = shalt.err (!%p9522_p13)
}
  0x68   : > { %s9634_s19 = smov 32   ;;  %s9635_s11 = smov 16  }
  0x69   : > { %s9636_s23 = smov 1  }
  0x6a   : > { %9373 = dma.hbm_to_vmem [thread:$0]  (%p10655_p6), %s9828_s22, 64, %s9830_s30, %s9832_s15, %s9634_s19, %s9635_s11, %s9636_s23  }
  0x6b PF: > { %p10656_p9 = scmp.ne.s32.totalorder %s10652_s18, 0 }
  0x6d   : > { %408 = sbr.rel (%p10656_p9) target bundleno = 2583 (0xa17), region = 93 }
  0x74   : > { %s9859_s28 = sand.u32 1, %s9604_s12   ;;  %p10657_p2 = scmp.ne.s32.totalorder %s10646_s26, 0 }
  0x75   : > { %s7552_s29 = sshll.u32 %s9859_s28, 4  ;;  %s7553_s27 = sshll.u32 %s9859_s28, 2 }
  0x76   : > { %s9863_s21 = scalar_lea.vmem [#allocation4], %s7552_s29  ;;  %s418_s9 = scalar_lea.sflag [#allocation6], %s9859_s28 }
  0x77   : > { %s9866_s10 = scalar_lea.vmem [#allocation5], %s7553_s27 }
  0x78   : > { %9587 = dma.done.wait (%p10657_p2), %s418_s9, 64  }
  0x79   : > { %9589 = vsyncadd (%p10657_p2), %s418_s9, 4294967232  ;;  %p10658_p6 = scmp.ne.s32.totalorder %s10644_s25, 0 }
  0x7b   : > { %9591 = dma.done.wait (%p10658_p6), [#allocation9], 512  }
  0x7c   : > { %9593 = vsyncadd (%p10658_p6), [#allocation9], 4294966784  ;;  %s9876_s24 = scalar_lea.vmem [#allocation10], %s7553_s27  ;;  %p7556_p4 = scmp.ne.s32.totalorder %s9612_s14, 0 }
  0x7d   : > { %v9637_v5 = vmov (!%p7556_p4), 0.0  }
  0x7e   : > { %470 = sbr.rel (%p7556_p4) target bundleno = 133 (0x85), region = 109  ;;  %471 = vst [vmem:[#allocation2] sm:$0x1] (!%p7556_p4), %v9637_v5 }
  0x85 PF: > { %v495_v6 = vld [vmem:[%s9863_s21] sm:$0xf]  ;;  %vm542_vm0 = vcmask 1043456   ;;  %vm529_vm1 = vcmask 31744   ;;  %v473_v8 = vld [vmem:[%s10589_s2 + $0x8] sm:$0xff]  ;;  %v475_v13 = vld [vmem:[%s10589_s2 + $0x18] sm:$0xff]  ;;  %v520_v62 = vlaneseq }
  0x86   : > { %v472_v7 = vld [vmem:[%s10589_s2] sm:$0xff]  ;;  %v544_v9 = vsel %vm542_vm0, %v495_v6, 0  ;;  %v534_v11 = vsel %vm529_vm1, %v473_v8, 0  ;;  %v474_v12 = vld [vmem:[%s10589_s2 + $0x10] sm:$0xff]  ;;  %v9638_v18 = vmov 0   ;;  %v540_v22 = vsel %vm529_vm1, %v475_v13, 0 }
  0x87   : > { %v531_v10 = vsel %vm529_vm1, %v472_v7, 0  ;;  %v9895_v14 = vand.u32 4294901760, %v544_v9  ;;  %v9899_v16 = vand.u32 4294901760, %v534_v11  ;;  %v537_v17 = vsel %vm529_vm1, %v474_v12, 0  ;;  %9468 = vset.pattern.permute.xlu0 %v9638_v18  ;;  %v476_v19 = vld [vmem:[%s10590_s3] sm:$0xff]  ;;  %9469 = vset.pattern.permute.xlu1 %v9638_v18  ;;  %v478_v20 = vld [vmem:[%s10590_s3 + $0x10] sm:$0xff] }
  0x88   : > { %v9897_v15 = vand.u32 4294901760, %v531_v10  ;;  %v9908_v21 = vand.u32 4294901760, %v537_v17  ;;  %501 = vperm.xlu0 %9468, %v476_v19   ;;  %511 = vperm.xlu1 %9469, %v478_v20   ;;  %v9919_v26 = vand.u32 4294901760, %v540_v22  ;;  %v477_v27 = vld [vmem:[%s10590_s3 + $0x8] sm:$0xff]  ;;  %v479_v28 = vld [vmem:[%s10590_s3 + $0x18] sm:$0xff]  ;;  %v480_v39 = vld [vmem:[%s10591_s4] sm:$0xff] }
  0x89   : > { %8007 = vmatprep.subr.mxu0 %v9895_v14  ;;  %v9916_v24 = vsub.f32 %v534_v11, %v9899_v16  ;;  %v654_v25 = vsub.f32 %v544_v9, %v9895_v14  ;;  %v481_v40 = vld [vmem:[%s10591_s4 + $0x8] sm:$0xff]  ;;  %v482_v47 = vld [vmem:[%s10591_s4 + $0x10] sm:$0xff]  ;;  %v483_v49 = vld [vmem:[%s10591_s4 + $0x18] sm:$0xff]  ;;  %vm1169_vm2 = vcmask 261120   ;;  %v521_v0 = vshrl.u32 %v520_v62, 7  ;;  %s7574_s11 = sshll.u32 %s9612_s14, 3 }
  0x8a   : > { %v9913_v23 = vsub.f32 %v531_v10, %v9897_v15  ;;  %8008 = vmatpush3.msra.mxu0 %v9895_v14  ;;  %v9929_v29 = vsub.f32 %v537_v17, %v9908_v21  ;;  %v9938_v33 = vsub.f32 %v540_v22, %v9919_v26  ;;  %v488_v50 = vld [vmem:[%s10593_s6] sm:$0xff]  ;;  %v489_v51 = vld [vmem:[%s10593_s6 + $0x8] sm:$0xff]  ;;  %v490_v52 = vld [vmem:[%s10593_s6 + $0x10] sm:$0xff]  ;;  %vm9640_vm4 = vmmov 0   ;;  %s7420_s27 = sshll.u32 %s9876_s24, 4  ;;  %s10700_s26 = sld [smem:[#allocation34_spill]]  ;;  %s10531_s27 = int_to_ptr.vmem [resolvable:$true] %s7420_s27 }
  0x8b   : > { %10660 = vst [vmem:[#allocation22_spill] sm:$0xff] %v9916_v24  ;;  %v9935_v31 = vand.u32 4294901760, %v9916_v24  ;;  %v655_v32 = vand.u32 4294901760, %v654_v25  ;;  %v491_v53 = vld [vmem:[%s10593_s6 + $0x18] sm:$0xff]  ;;  %v493_v54 = vld [vmem:[#allocation3] sm:$0x1] }
  0x8c   : > { %10659 = vst [vmem:[#allocation21_spill] sm:$0xff] %v9913_v23  ;;  %10661 = vst [vmem:[#allocation23_spill] sm:$0xff] %v9929_v29  ;;  %v9932_v30 = vand.u32 4294901760, %v9913_v23  ;;  %v9941_v34 = vand.u32 4294901760, %v9929_v29  ;;  %506 = vperm.xlu0 %9468, %v477_v27   ;;  %516 = vperm.xlu1 %9469, %v479_v28   ;;  %v9948_v38 = vand.u32 4294901760, %v9938_v33  ;;  %v484_v55 = vld [vmem:[#allocation8] sm:$0xff] }
  0x8d   : > { %10663 = vst [vmem:[#allocation25_spill] sm:$0xff] %v9935_v31  ;;  %10664 = vst [vmem:[#allocation26_spill] sm:$0xff] %v9938_v33  ;;  %v625_v36 = vsub.f32 %v9916_v24, %v9935_v31  ;;  %v656_v37 = vsub.f32 %v654_v25, %v655_v32  ;;  %v1171_v56 = vsel %vm1169_vm2, %v484_v55, 0  ;;  %v496_v63 = vld [vmem:[%s9866_s10] sm:$0x1]  ;;  %v10033_v4 = vsub.s32 0, %v521_v0 }
  0x8e   : > { %10662 = vst [vmem:[#allocation24_spill] sm:$0xff] %v9932_v30  ;;  %10665 = vst [vmem:[#allocation27_spill] sm:$0xff] %v9941_v34  ;;  %v615_v35 = vsub.f32 %v9913_v23, %v9932_v30  ;;  %v635_v41 = vsub.f32 %v9929_v29, %v9941_v34  ;;  %v645_v45 = vsub.f32 %v9938_v33, %v9948_v38  ;;  %v10015_v57 = vand.u32 4294901760, %v1171_v56  ;;  %v494_v3 = vld [vmem:[#allocation2] sm:$0x1]  ;;  %v485_v6 = vld [vmem:[#allocation8 + $0x8] sm:$0xff] }
  0x8f   : > { %10666 = vst [vmem:[#allocation28_spill] sm:$0xff] %v9948_v38  ;;  %v9960_v43 = vand.u32 4294901760, %v625_v36  ;;  %v657_v44 = vand.u32 4294901760, %v656_v37  ;;  %vm497_vm3 = vcmp.eq.f32.partialorder %v496_v63, %v496_v63  ;;  %v486_v10 = vld [vmem:[#allocation8 + $0x10] sm:$0xff]  ;;  %v1174_v11 = vsel %vm1169_vm2, %v485_v6, 0  ;;  %v487_v13 = vld [vmem:[#allocation8 + $0x18] sm:$0xff] }
  0x90   : > { %v9958_v42 = vand.u32 4294901760, %v615_v35  ;;  %v9964_v46 = vand.u32 4294901760, %v635_v41  ;;  %1123 = vperm.xlu0 %9468, %v480_v39   ;;  %1128 = vperm.xlu1 %9469, %v481_v40   ;;  %v9971_v48 = vand.u32 4294901760, %v645_v45  ;;  %v10018_v58 = vsub.f32 %v1171_v56, %v10015_v57  ;;  %s7405_s14 = scalar_lea.sflag [#allocation7], %s9859_s28  ;;  %s9526_s22 = scalar_lea.vmem %s10531_s27, 64 }
  0x91   : > { %8015 = vmatprep.subr.mxu0 %v657_v44  ;;  %v498_v5 = vsel %vm497_vm3, %v496_v63, %v494_v3  ;;  %v1177_v12 = vsel %vm1169_vm2, %v486_v10, 0  ;;  %v10043_v17 = vand.u32 4294901760, %v1174_v11  ;;  %p9527_p7 = scmp.ne.s32.totalorder %s10531_s27, %s9526_s22  ;;  %s9642_s25 = smov [#allocation10]  }
  0x92   : > { %8009 = vmatprep.mubr.f32.mxu0 %v9958_v42  ;;  %v10021_v59 = vand.u32 4294901760, %v10018_v58  ;;  %v523_v9 = vrot.slane %v498_v5, %v10033_v4  ;;  %v10050_v28 = vand.u32 4294901760, %v1177_v12  ;;  %s9530_s15 = sshll.u32 %s9642_s25, 4  ;;  %s9531_s15 = int_to_ptr.vmem [resolvable:$false] %s9530_s15 }
  0x93   : > { %8010 = vmatmul.mubr.f32.vlgmr.msra.gmra.mrb[0].mxu0 %v9960_v43  ;;  %v10056_v39 = vsub.f32 %v1174_v11, %v10043_v17  ;;  %s9532_s20 = scalar_lea.vmem %s9531_s15, 128  ;;  %p9533_p1 = scmp.lt.s32.totalorder %s10531_s27, %s9531_s15 }
  0x94   : > { %8016 = vmatpush3.msra.mxu0 %v657_v44  ;;  %8012 = vmatprep.mubr.f32.mxu0 %v9964_v46  ;;  %v1254_v60 = vsub.f32 %v10018_v58, %v10021_v59  ;;  %p9534_p5 = scmp.lt.s32.totalorder %s9532_s20, %s9526_s22 }
  0x95   : > { %8023 = vmatprep.subr.mxu0 %v654_v25  ;;  %1133 = vperm.xlu0 %9468, %v482_v47   ;;  %v10071_v62 = vand.u32 4294901760, %v10056_v39 }
  0x96   : > { %1138 = vperm.xlu1 %9469, %v483_v49   ;;  %v10025_v61 = vand.u32 4294901760, %v1254_v60  ;;  %p9535_p10 = por %p9534_p5, %p9533_p1 }
  0x97   : > { %8013 = vmatmul.mubr.f32.gmra.mrb[2].mxu0 %v9971_v48 }
  0x98   : > { %8017 = vmatprep.mubr.f32.mxu0 %v9897_v15  ;;  %8063 = vmatprep.mubr.f32.mxu1 %v10025_v61 }
  0x99   : > { %1151 = vperm.xlu0 %9468, %v488_v50  }
  0x9a   : > { %1156 = vperm.xlu1 %9469, %v489_v51   ;;  %v10063_v51 = vsub.f32 %v1177_v12, %v10050_v28 }
  0x9b   : > { %8018 = vmatmul.mubr.f32.vlgmr.msra.gmra.mrb[0].mxu0 %v9899_v16 }
  0x9c   : > { %8024 = vmatpush3.msra.mxu0 %v654_v25  ;;  %8020 = vmatprep.mubr.f32.mxu0 %v9908_v21 }
  0x9d   : > { %8031 = vmatprep.subr.mxu0 %v9895_v14  ;;  %1161 = vperm.xlu0 %9468, %v490_v52  }
  0x9e   : > { %1166 = vperm.xlu1 %9469, %v491_v53  }
  0x9f   : > { %8021 = vmatmul.mubr.f32.gmra.mrb[2].mxu0 %v9919_v26 }
  0xa0   : > { %8025 = vmatprep.mubr.f32.mxu0 %v9913_v23 }
  0xa1   : > { %1798 = vperm.xlu0 %9468, %v493_v54  }
  0xa3   : > { %8026 = vmatmul.mubr.f32.vlgmr.msra.gmra.mrb[0].mxu0 %v9916_v24 }
  0xa4   : > { %8032 = vmatpush3.msra.mxu0 %v9895_v14  ;;  %8028 = vmatprep.mubr.f32.mxu0 %v9929_v29 }
  0xa5   : > { %8039 = vmatprep.subr.mxu0 %v655_v32 }
  0xa7   : > { %8029 = vmatmul.mubr.f32.gmra.mrb[2].mxu0 %v9938_v33 }
  0xa8   : > { %8033 = vmatprep.mubr.f32.mxu0 %v9932_v30 }
  0xab   : > { %8034 = vmatmul.mubr.f32.vlgmr.msra.gmra.mrb[0].mxu0 %v9935_v31 }
  0xac   : > { %8040 = vmatpush3.msra.mxu0 %v655_v32  ;;  %8036 = vmatprep.mubr.f32.mxu0 %v9941_v34  ;;  %v1180_v32 = vsel %vm1169_vm2, %v487_v13, 0 }
  0xad   : > { %8047 = vmatprep.subr.mxu0 %v9895_v14  ;;  %v10060_v45 = vand.u32 4294901760, %v1180_v32 }
  0xaf   : > { %8037 = vmatmul.mubr.f32.gmra.mrb[2].mxu0 %v9948_v38  ;;  %v10075_v3 = vsub.f32 %v1180_v32, %v10060_v45 }
  0xb0   : > { %8041 = vmatprep.mubr.f32.mxu0 %v9897_v15 }
  0xb3   : > { %8042 = vmatmul.mubr.f32.vlgmr.msra.gmra.mrb[0].mxu0 %v9899_v16 }
  0xb4   : > { %8048 = vmatpush3.msra.mxu0 %v9895_v14  ;;  %8044 = vmatprep.mubr.f32.mxu0 %v9908_v21 }
  0xb7   : > { %8045 = vmatmul.mubr.f32.gmra.mrb[2].mxu0 %v9919_v26 }
  0xb8   : > { %8049 = vmatprep.mubr.f32.mxu0 %v9897_v15 }
  0xbb   : > { %8050 = vmatmul.mubr.f32.vlgmr.msra.gmra.mrb[0].mxu0 %v9899_v16 }
  0xbc   : > { %8052 = vmatprep.mubr.f32.mxu0 %v9908_v21 }
  0xbf   : > { %8053 = vmatmul.mubr.f32.gmra.mrb[2].mxu0 %v9919_v26 }
 0x107   : > { %v10029_v1 = vpop.permute.xlu1 %511  ;;  %v10031_v2 = vpop.permute.xlu0 %501 }
 0x108   : > { %10667 = vst [vmem:[#allocation29_spill] sm:$0xff] %v10029_v1  ;;  %v525_v20 = vmul.f32 %v523_v9, %v10031_v2  ;;  %v527_v44 = vmul.f32 %v523_v9, %v10029_v1 }
 0x10b   : > { %v10035_v7 = vpop.permute.xlu1 %516  ;;  %v10037_v8 = vpop.permute.xlu0 %506 }
 0x10c   : > { %v526_v14 = vmul.f32 %v523_v9, %v10037_v8  ;;  %v528_v37 = vmul.f32 %v523_v9, %v10035_v7  ;;  %v10078_v9 = vand.u32 4294901760, %v10063_v51 }
 0x10f   : > { %v10045_v18 = vpop.permute.xlu1 %1128  ;;  %v10048_v22 = vpop.permute.xlu0 %1123 }
 0x114   : > { %v10067_v55 = vpop.permute.xlu0 %1133 }
 0x115   : > { %v10065_v52 = vpop.permute.xlu1 %1138 }
 0x18e   : > { %v8051_v19 = vpop.f32.mrb[0].mxu0 }
 0x18f   : > { %v9135_v25 = vadd.f32 %v8051_v19, %v526_v14  ;;  %v1099_v27 = vpop.f32.mrb[1].mxu0  ;;  %v1264_v14 = vsub.f32 %v10056_v39, %v10071_v62 }
 0x190   : > { %v9136_v35 = vadd.f32 %v1099_v27, %v525_v20  ;;  %v10086_v27 = vand.u32 4294901760, %v10075_v3 }
 0x191   : > { %v1142_v36 = vadd.f32 %v9135_v25, %v10045_v18 }
 0x192   : > { %v1141_v40 = vadd.f32 %v9136_v35, %v10048_v22  ;;  %v8054_v41 = vpop.f32.mrb[2].mxu0 }
 0x193   : > { %v1146_v47 = vmax.f32 %v1142_v36, 0.0  ;;  %v9137_v49 = vadd.f32 %v8054_v41, %v528_v37  ;;  %v1111_v50 = vpop.f32.mrb[3].mxu0  ;;  %v1274_v37 = vsub.f32 %v10063_v51, %v10078_v9 }
 0x194   : > { %v1145_v53 = vmax.f32 %v1141_v40, 0.0  ;;  %v9138_v54 = vadd.f32 %v1111_v50, %v527_v44 }
 0x195   : > { %v1186_v56 = vand.u32 4294901760, %v1146_v47  ;;  %v1144_v60 = vadd.f32 %v9137_v49, %v10065_v52  ;;  %v10093_v49 = vand.u32 4294901760, %v1264_v14 }
 0x196   : > { %v1183_v63 = vand.u32 4294901760, %v1145_v53  ;;  %v1143_v0 = vadd.f32 %v9138_v54, %v10067_v55 }
 0x197   : > { %v1300_v5 = vsub.f32 %v1146_v47, %v1186_v56  ;;  %v1148_v6 = vmax.f32 %v1144_v60, 0.0 }
 0x198   : > { %v10080_v10 = vpack.c.bf16 %v1186_v56, %v1183_v63  ;;  %v1293_v11 = vsub.f32 %v1145_v53, %v1183_v63  ;;  %v1147_v12 = vmax.f32 %v1143_v0, 0.0  ;;  %v1284_v56 = vsub.f32 %v10075_v3, %v10086_v27 }
 0x199   : > { %v1192_v13 = vand.u32 4294901760, %v1148_v6  ;;  %v1301_v19 = vand.u32 4294901760, %v1300_v5  ;;  %v10099_v0 = vand.u32 4294901760, %v1274_v37 }
 0x19a   : > { %v1189_v20 = vand.u32 4294901760, %v1147_v12  ;;  %8800 = vmatprep.subr.bf16.mxu1 %v10080_v10  ;;  %v1294_v25 = vand.u32 4294901760, %v1293_v11  ;;  %v8815_v32 = vpack.c.bf16 %v1300_v5, %v1293_v11  ;;  %v10102_v14 = vand.u32 4294901760, %v1284_v56  ;;  %v10174_v56 = vpop.permute.xlu0 %1151 }
 0x19b   : > { %v1314_v35 = vsub.f32 %v1148_v6, %v1192_v13  ;;  %8802 = vmatpush3.bf16.msra.mxu1 %v10080_v10  ;;  %v1302_v36 = vsub.f32 %v1300_v5, %v1301_v19  ;;  %10669 = vst [vmem:[#allocation31_spill] sm:$0xff] %v10174_v56 }
 0x19c   : > { %v10091_v40 = vpack.c.bf16 %v1192_v13, %v1189_v20  ;;  %v1307_v41 = vsub.f32 %v1147_v12, %v1189_v20  ;;  %v1295_v44 = vsub.f32 %v1293_v11, %v1294_v25  ;;  %v8831_v47 = vpack.c.bf16 %v1301_v19, %v1294_v25  ;;  %v7557_v25 = vld [vmem:[%s9863_s21 + $0x4] sm:$0xf] }
 0x19d   : > { %v1303_v50 = vand.u32 4294901760, %v1302_v36  ;;  %v1315_v53 = vand.u32 4294901760, %v1314_v35 }
 0x19e   : > { %8804 = vmatprep.subr.bf16.mxu1 %v10091_v40  ;;  %v1296_v54 = vand.u32 4294901760, %v1295_v44  ;;  %v1308_v60 = vand.u32 4294901760, %v1307_v41  ;;  %v8819_v63 = vpack.c.bf16 %v1314_v35, %v1307_v41 }
 0x19f   : > { %8806 = vmatpush3.bf16.msra.mxu1 %v10091_v40  ;;  %v1316_v5 = vsub.f32 %v1314_v35, %v1315_v53 }
 0x1a0   : > { %v8807_v6 = vpack.c.bf16 %v1303_v50, %v1296_v54  ;;  %v1309_v11 = vsub.f32 %v1307_v41, %v1308_v60  ;;  %v8835_v12 = vpack.c.bf16 %v1315_v53, %v1308_v60  ;;  %v10172_v54 = vpop.permute.xlu1 %1156 }
 0x1a1   : > { %v1317_v13 = vand.u32 4294901760, %v1316_v5  ;;  %10668 = vst [vmem:[#allocation30_spill] sm:$0xff] %v10172_v54 }
 0x1a2   : > { %8064 = vmatmul.mubr.f32.vlgmr.msra.gmra.mrb[0].mxu1 %v10093_v49  ;;  %8808 = vmatprep.subr.bf16.mxu1 %v8807_v6  ;;  %v1310_v19 = vand.u32 4294901760, %v1309_v11 }
 0x1a3   : > { %8810 = vmatpush3.bf16.msra.mxu1 %v8807_v6  ;;  %8066 = vmatprep.mubr.f32.mxu1 %v10099_v0 }
 0x1a4   : > { %v8811_v20 = vpack.c.bf16 %v1317_v13, %v1310_v19  ;;  %v10184_v19 = vpop.permute.xlu1 %1166 }
 0x1a5   : > { %10670 = vst [vmem:[#allocation32_spill] sm:$0xff] %v10184_v19 }
 0x1a6   : > { %8067 = vmatmul.mubr.f32.gmra.mrb[2].mxu1 %v10102_v14  ;;  %8812 = vmatprep.subr.bf16.mxu1 %v8811_v20 }
 0x1a7   : > { %8814 = vmatpush3.bf16.msra.mxu1 %v8811_v20  ;;  %8077 = vmatprep.mubr.f32.mxu1 %v10015_v57 }
 0x1a8   : > { %8816 = vmatprep.subr.bf16.mxu1 %v8815_v32 }
 0x1aa   : > { %8078 = vmatmul.mubr.f32.vlgmr.msra.gmra.mrb[0].mxu1 %v10043_v17 }
 0x1ab   : > { %8818 = vmatpush3.bf16.msra.mxu1 %v8815_v32  ;;  %8080 = vmatprep.mubr.f32.mxu1 %v10050_v28  ;;  %v2311_v32 = vsel %vm542_vm0, %v7557_v25, 0 }
 0x1ac   : > { %8820 = vmatprep.subr.bf16.mxu1 %v8819_v63  ;;  %v2314_v35 = vand.u32 4294901760, %v2311_v32 }
 0x1ae   : > { %8081 = vmatmul.mubr.f32.gmra.mrb[2].mxu1 %v10060_v45  ;;  %v2421_v36 = vsub.f32 %v2311_v32, %v2314_v35  ;;  %v10186_v32 = vpop.permute.xlu0 %1161 }
 0x1af   : > { %8822 = vmatpush3.bf16.msra.mxu1 %v8819_v63  ;;  %8091 = vmatprep.mubr.f32.mxu1 %v10018_v58  ;;  %10671 = vst [vmem:[#allocation33_spill] sm:$0xff] %v10186_v32 }
 0x1b0   : > { %8824 = vmatprep.subr.bf16.mxu1 %v10080_v10  ;;  %v2422_v37 = vand.u32 4294901760, %v2421_v36 }
 0x1b2   : > { %8092 = vmatmul.mubr.f32.vlgmr.msra.gmra.mrb[0].mxu1 %v10056_v39  ;;  %v2423_v41 = vsub.f32 %v2421_v36, %v2422_v37 }
 0x1b3   : > { %8826 = vmatpush3.bf16.msra.mxu1 %v10080_v10  ;;  %8094 = vmatprep.mubr.f32.mxu1 %v10063_v51 }
 0x1b4   : > { %8828 = vmatprep.subr.bf16.mxu1 %v10091_v40  ;;  %v2424_v44 = vand.u32 4294901760, %v2423_v41 }
 0x1b6   : > { %8095 = vmatmul.mubr.f32.gmra.mrb[2].mxu1 %v10075_v3 }
 0x1b7   : > { %8830 = vmatpush3.bf16.msra.mxu1 %v10091_v40  ;;  %8105 = vmatprep.mubr.f32.mxu1 %v10021_v59 }
 0x1b8   : > { %8832 = vmatprep.subr.bf16.mxu1 %v8831_v47 }
 0x1ba   : > { %8106 = vmatmul.mubr.f32.vlgmr.msra.gmra.mrb[0].mxu1 %v10071_v62 }
 0x1bb   : > { %8834 = vmatpush3.bf16.msra.mxu1 %v8831_v47  ;;  %8108 = vmatprep.mubr.f32.mxu1 %v10078_v9  ;;  %v492_v47 = vld [vmem:[%s10594_s7] sm:$0x1] }
 0x1bc   : > { %8836 = vmatprep.subr.bf16.mxu1 %v8835_v12  ;;  %v1806_v50 = vsel %vm1169_vm2, %v492_v47, 0 }
 0x1bd   : > { %v10170_v53 = vand.u32 4294901760, %v1806_v50 }
 0x1be   : > { %8109 = vmatmul.mubr.f32.gmra.mrb[2].mxu1 %v10086_v27 }
 0x1bf   : > { %8838 = vmatpush3.bf16.msra.mxu1 %v8835_v12  ;;  %8119 = vmatprep.mubr.f32.mxu1 %v10015_v57  ;;  %v10177_v60 = vsub.f32 %v1806_v50, %v10170_v53 }
 0x1c0   : > { %8840 = vmatprep.subr.bf16.mxu1 %v10080_v10 }
 0x1c1   : > { %v10182_v13 = vand.u32 4294901760, %v10177_v60 }
 0x1c2   : > { %8120 = vmatmul.mubr.f32.vlgmr.msra.gmra.mrb[0].mxu1 %v10043_v17 }
 0x1c3   : > { %8842 = vmatpush3.bf16.msra.mxu1 %v10080_v10  ;;  %8122 = vmatprep.mubr.f32.mxu1 %v10050_v28  ;;  %v10612_v10 = vmov 0.0|0.0  }
 0x1c4   : > { %8844 = vmatprep.subr.bf16.mxu1 %v10091_v40  ;;  %8847 = vmatprep.subr.bf16.mxu0 %v10612_v10 }
 0x1c6   : > { %8123 = vmatmul.mubr.f32.gmra.mrb[2].mxu1 %v10060_v45 }
 0x1c7   : > { %8846 = vmatpush3.bf16.msra.mxu1 %v10091_v40  ;;  %8133 = vmatprep.mubr.f32.mxu1 %v10015_v57  ;;  %v10610_v40 = vmov 0.0  }
 0x1c8   : > { %8205 = vmatprep.subr.mxu1 %v2314_v35  ;;  %8147 = vmatprep.mubr.msk.f32.mxu0 %vm9640_vm4, %v10610_v40 }
 0x1ca   : > { %8134 = vmatmul.mubr.f32.vlgmr.msra.gmra.mrb[0].mxu1 %v10043_v17 }
 0x1cb   : > { %8136 = vmatprep.mubr.f32.mxu1 %v10050_v28  ;;  %8206 = vmatpush3.msra.mxu1 %v2314_v35 }
 0x1cc   : > { %8213 = vmatprep.subr.mxu1 %v2424_v44 }
 0x1ce   : > { %8137 = vmatmul.mubr.f32.gmra.mrb[2].mxu1 %v10060_v45 }
 0x1cf   : > { %8207 = vmatprep.mubr.f32.mxu1 %v9958_v42 }
 0x1d2   : > { %8208 = vmatmul.mubr.f32.vlgmr.msra.gmra.mrb[4].mxu1 %v9960_v43 }
 0x1d3   : > { %8210 = vmatprep.mubr.f32.mxu1 %v9964_v46  ;;  %8214 = vmatpush3.msra.mxu1 %v2424_v44 }
 0x1d4   : > { %8221 = vmatprep.subr.mxu1 %v2421_v36 }
 0x1d6   : > { %8211 = vmatmul.mubr.f32.gmra.mrb[6].mxu1 %v9971_v48 }
 0x1d7   : > { %8215 = vmatprep.mubr.f32.mxu1 %v9897_v15 }
 0x1da   : > { %8216 = vmatmul.mubr.f32.vlgmr.msra.gmra.mrb[4].mxu1 %v9899_v16 }
 0x1db   : > { %8218 = vmatprep.mubr.f32.mxu1 %v9908_v21  ;;  %8222 = vmatpush3.msra.mxu1 %v2421_v36 }
 0x1dc   : > { %8229 = vmatprep.subr.mxu1 %v2314_v35 }
 0x1de   : > { %8219 = vmatmul.mubr.f32.gmra.mrb[6].mxu1 %v9919_v26 }
 0x1df   : > { %8223 = vmatprep.mubr.f32.mxu1 %v9913_v23 }
 0x1e2   : > { %8224 = vmatmul.mubr.f32.vlgmr.msra.gmra.mrb[4].mxu1 %v9916_v24 }
 0x1e3   : > { %8226 = vmatprep.mubr.f32.mxu1 %v9929_v29  ;;  %8230 = vmatpush3.msra.mxu1 %v2314_v35 }
 0x1e4   : > { %8237 = vmatprep.subr.mxu1 %v2422_v37 }
 0x1e6   : > { %8227 = vmatmul.mubr.f32.gmra.mrb[6].mxu1 %v9938_v33 }
 0x1e7   : > { %8231 = vmatprep.mubr.f32.mxu1 %v9932_v30 }
 0x1ea   : > { %8232 = vmatmul.mubr.f32.vlgmr.msra.gmra.mrb[4].mxu1 %v9935_v31 }
 0x1eb   : > { %8234 = vmatprep.mubr.f32.mxu1 %v9941_v34  ;;  %8238 = vmatpush3.msra.mxu1 %v2422_v37  ;;  %v10672_v34 = vmov 0.0|0.0  }
 0x1ec   : > { %8245 = vmatprep.subr.mxu1 %v2314_v35 }
 0x1ee   : > { %8235 = vmatmul.mubr.f32.gmra.mrb[6].mxu1 %v9948_v38 }
 0x1ef   : > { %8239 = vmatprep.mubr.f32.mxu1 %v9897_v15 }
 0x1f2   : > { %8240 = vmatmul.mubr.f32.vlgmr.msra.gmra.mrb[4].mxu1 %v9899_v16 }
 0x1f3   : > { %8242 = vmatprep.mubr.f32.mxu1 %v9908_v21  ;;  %8246 = vmatpush3.msra.mxu1 %v2314_v35 }
 0x1f4   : > { %8931 = vmatprep.subr.bf16.mxu1 %v10612_v10 }
 0x1f6   : > { %8243 = vmatmul.mubr.f32.gmra.mrb[6].mxu1 %v9919_v26 }
 0x1f7   : > { %8247 = vmatprep.mubr.f32.mxu1 %v9897_v15 }
 0x1fa   : > { %8248 = vmatmul.mubr.f32.vlgmr.msra.gmra.mrb[4].mxu1 %v9899_v16 }
 0x1fb   : > { %8250 = vmatprep.mubr.f32.mxu1 %v9908_v21 }
 0x1fe   : > { %8251 = vmatmul.mubr.f32.gmra.mrb[6].mxu1 %v9919_v26 }
 0x1ff   : > { %8345 = vmatprep.mubr.msk.f32.mxu1 %vm9640_vm4, %v10610_v40 }
 0x29d   : > { %v8135_v63 = vpop.f32.mrb[0].mxu1 }
 0x29e   : > { %v9139_v5 = vadd.f32 %v8135_v63, %v10172_v54  ;;  %v1774_v6 = vpop.f32.mrb[1].mxu1 }
 0x29f   : > { %v9140_v11 = vadd.f32 %v1774_v6, %v10174_v56  ;;  %v1880_v6 = vsub.f32 %v10177_v60, %v10182_v13 }
 0x2a0   : > { %v1812_v12 = vand.u32 4294901760, %v9139_v5 }
 0x2a1   : > { %v1809_v20 = vand.u32 4294901760, %v9140_v11  ;;  %v8138_v25 = vpop.f32.mrb[2].mxu1 }
 0x2a2   : > { %v1896_v35 = vsub.f32 %v9139_v5, %v1812_v12  ;;  %v9141_v36 = vadd.f32 %v8138_v25, %v10184_v19  ;;  %v1786_v37 = vpop.f32.mrb[3].mxu1 }
 0x2a3   : > { %v8848_v41 = vpack.c.bf16 %v1812_v12, %v1809_v20  ;;  %v1889_v44 = vsub.f32 %v9140_v11, %v1809_v20  ;;  %v9142_v47 = vadd.f32 %v1786_v37, %v10186_v32  ;;  %v10193_v37 = vand.u32 4294901760, %v1880_v6 }
 0x2a4   : > { %v1897_v50 = vand.u32 4294901760, %v1896_v35  ;;  %v1818_v63 = vand.u32 4294901760, %v9141_v36 }
 0x2a5   : > { %v1890_v40 = vand.u32 4294901760, %v1889_v44  ;;  %v8860_v10 = vpack.c.bf16 %v1896_v35, %v1889_v44  ;;  %v1815_v56 = vand.u32 4294901760, %v9142_v47  ;;  %8849 = vmatpush3.bf16.msra.mxu0 %v8848_v41 }
 0x2a6   : > { %v1898_v54 = vsub.f32 %v1896_v35, %v1897_v50  ;;  %v1910_v38 = vsub.f32 %v9141_v36, %v1818_v63  ;;  %8850 = vmatprep.subr.bf16.mxu0 %v10672_v34 }
 0x2a7   : > { %v1891_v5 = vsub.f32 %v1889_v44, %v1890_v40  ;;  %v8851_v25 = vpack.c.bf16 %v1818_v63, %v1815_v56  ;;  %v1903_v19 = vsub.f32 %v9142_v47, %v1815_v56  ;;  %v8872_v12 = vpack.c.bf16 %v1897_v50, %v1890_v40 }
 0x2a8   : > { %v1899_v11 = vand.u32 4294901760, %v1898_v54  ;;  %v1911_v20 = vand.u32 4294901760, %v1910_v38  ;;  %v10673_v40 = vmov 0.0  }
 0x2a9   : > { %v1892_v32 = vand.u32 4294901760, %v1891_v5  ;;  %v1904_v31 = vand.u32 4294901760, %v1903_v19  ;;  %v8863_v30 = vpack.c.bf16 %v1910_v38, %v1903_v19  ;;  %8852 = vmatpush3.bf16.msra.mxu0 %v8851_v25 }
 0x2aa   : > { %v1912_v33 = vsub.f32 %v1910_v38, %v1911_v20  ;;  %8853 = vmatprep.subr.bf16.mxu0 %v10672_v34  ;;  %v7558_v38 = vld [vmem:[%s9866_s10 + $0x1] sm:$0x1] }
 0x2ab   : > { %v1905_v29 = vsub.f32 %v1903_v19, %v1904_v31  ;;  %v8854_v35 = vpack.c.bf16 %v1899_v11, %v1892_v32  ;;  %v8875_v36 = vpack.c.bf16 %v1911_v20, %v1904_v31  ;;  %vm2298_vm5 = vcmp.eq.f32.partialorder %v7558_v38, %v7558_v38 }
 0x2ac   : > { %v1913_v24 = vand.u32 4294901760, %v1912_v33  ;;  %8148 = vmatmul.mubr.f32.vlgmr.msra.gmra.mrb[4].mxu0 %v10193_v37  ;;  %v1799_v33 = vpop.permute.xlu0 %1798 }
 0x2ad   : > { %v1906_v44 = vand.u32 4294901760, %v1905_v29  ;;  %8855 = vmatpush3.bf16.msra.mxu0 %v8854_v35  ;;  %8158 = vmatprep.mubr.msk.f32.mxu0 %vm9640_vm4, %v10673_v40 }
 0x2ae   : > { %8856 = vmatprep.subr.bf16.mxu0 %v10672_v34 }
 0x2af   : > { %v8857_v54 = vpack.c.bf16 %v1913_v24, %v1906_v44 }
 0x2b1   : > { %8858 = vmatpush3.bf16.msra.mxu0 %v8857_v54 }
 0x2b2   : > { %8859 = vmatprep.subr.bf16.mxu0 %v10672_v34 }
 0x2b4   : > { %8159 = vmatmul.mubr.f32.vlgmr.msra.gmra.mrb[4].mxu0 %v10170_v53 }
 0x2b5   : > { %8861 = vmatpush3.bf16.msra.mxu0 %v8860_v10  ;;  %8169 = vmatprep.mubr.msk.f32.mxu0 %vm9640_vm4, %v10673_v40  ;;  %v10224_v10 = vrot.slane %v1799_v33, %v10033_v4 }
 0x2b6   : > { %8862 = vmatprep.subr.bf16.mxu0 %v10672_v34 }
 0x2b9   : > { %8864 = vmatpush3.bf16.msra.mxu0 %v8863_v30 }
 0x2ba   : > { %8865 = vmatprep.subr.bf16.mxu0 %v10672_v34 }
 0x2bc   : > { %8170 = vmatmul.mubr.f32.vlgmr.msra.gmra.mrb[4].mxu0 %v10177_v60 }
 0x2bd   : > { %8867 = vmatpush3.bf16.msra.mxu0 %v8848_v41  ;;  %8180 = vmatprep.mubr.msk.f32.mxu0 %vm9640_vm4, %v10673_v40 }
 0x2be   : > { %8868 = vmatprep.subr.bf16.mxu0 %v10672_v34 }
 0x2c1   : > { %8870 = vmatpush3.bf16.msra.mxu0 %v8851_v25 }
 0x2c2   : > { %8871 = vmatprep.subr.bf16.mxu0 %v10672_v34 }
 0x2c4   : > { %8181 = vmatmul.mubr.f32.vlgmr.msra.gmra.mrb[4].mxu0 %v10182_v13 }
 0x2c5   : > { %8873 = vmatpush3.bf16.msra.mxu0 %v8872_v12  ;;  %8191 = vmatprep.mubr.msk.f32.mxu0 %vm9640_vm4, %v10673_v40 }
 0x2c6   : > { %8874 = vmatprep.subr.bf16.mxu0 %v10672_v34 }
 0x2c9   : > { %8876 = vmatpush3.bf16.msra.mxu0 %v8875_v36 }
 0x2ca   : > { %8877 = vmatprep.subr.bf16.mxu0 %v10672_v34 }
 0x2cc   : > { %8192 = vmatmul.mubr.f32.vlgmr.msra.gmra.mrb[4].mxu0 %v10170_v53 }
 0x2cd   : > { %8879 = vmatpush3.bf16.msra.mxu0 %v8848_v41  ;;  %8202 = vmatprep.mubr.msk.f32.mxu0 %vm9640_vm4, %v10673_v40  ;;  %v8249_v24 = vpop.f32.mrb[4].mxu1 }
 0x2ce   : > { %8880 = vmatprep.subr.bf16.mxu0 %v10672_v34  ;;  %v2866_v29 = vpop.f32.mrb[5].mxu1 }
 0x2d1   : > { %8882 = vmatpush3.bf16.msra.mxu0 %v8851_v25  ;;  %v8252_v30 = vpop.f32.mrb[6].mxu1 }
 0x2d2   : > { %v2878_v31 = vpop.f32.mrb[7].mxu1 }
 0x2d4   : > { %8203 = vmatmul.mubr.f32.vlgmr.msra.gmra.mrb[4].mxu0 %v10170_v53 }
 0x2d5   : > { %8261 = vmatprep.mubr.f32.mxu0 %v10025_v61 }
 0x3a7   : > { %v2289_v56 = vpop.f32.mrb[4].mxu0 }
 0x3a8   : > { %v9143_v19 = vadd.f32 %v2289_v56, %v10224_v10  ;;  %v8204_v32 = vpop.f32.mrb[5].mxu0 }
 0x3aa   : > { %2293 = vst [vmem:[%s9876_s24] sm:$0x1] %v9143_v19  ;;  %v2299_v41 = vsel %vm2298_vm5, %v7558_v38, %v9143_v19 }
 0x3ab   : > { %v2304_v47 = vrot.slane %v2299_v41, %v10033_v4 }
 0x3ad   : > { %v2306_v50 = vmul.f32 %v2304_v47, %v10031_v2  ;;  %v2307_v63 = vmul.f32 %v2304_v47, %v10037_v8  ;;  %v2308_v6 = vmul.f32 %v2304_v47, %v10029_v1  ;;  %v2309_v5 = vmul.f32 %v2304_v47, %v10035_v7 }
 0x3af   : > { %v9145_v25 = vadd.f32 %v2866_v29, %v2306_v50  ;;  %v9144_v12 = vadd.f32 %v8249_v24, %v2307_v63  ;;  %v9147_v11 = vadd.f32 %v2878_v31, %v2308_v6  ;;  %v9146_v20 = vadd.f32 %v8252_v30, %v2309_v5 }
 0x3b1   : > { %v2888_v35 = vadd.f32 %v9145_v25, %v10048_v22  ;;  %v2889_v36 = vadd.f32 %v9144_v12, %v10045_v18  ;;  %v2890_v44 = vadd.f32 %v9147_v11, %v10067_v55  ;;  %v2891_v54 = vadd.f32 %v9146_v20, %v10065_v52 }
 0x3b3   : > { %v2892_v33 = vmax.f32 %v2888_v35, 0.0  ;;  %v2893_v38 = vmax.f32 %v2889_v36, 0.0  ;;  %v2894_v56 = vmax.f32 %v2890_v44, 0.0  ;;  %v2895_v19 = vmax.f32 %v2891_v54, 0.0 }
 0x3b5   : > { %v2897_v32 = vand.u32 4294901760, %v2892_v33  ;;  %v2900_v41 = vand.u32 4294901760, %v2893_v38  ;;  %v2903_v1 = vand.u32 4294901760, %v2894_v56  ;;  %v2906_v47 = vand.u32 4294901760, %v2895_v19 }
 0x3b7   : > { %v10237_v29 = vpack.c.bf16 %v2900_v41, %v2897_v32  ;;  %v10239_v24 = vpack.c.bf16 %v2906_v47, %v2903_v1  ;;  %v3007_v30 = vsub.f32 %v2892_v33, %v2897_v32  ;;  %v3014_v31 = vsub.f32 %v2893_v38, %v2900_v41 }
 0x3b8   : > { %v3021_v50 = vsub.f32 %v2894_v56, %v2903_v1  ;;  %v3028_v63 = vsub.f32 %v2895_v19, %v2906_v47 }
 0x3b9   : > { %8884 = vmatprep.subr.bf16.mxu0 %v10237_v29  ;;  %v3008_v6 = vand.u32 4294901760, %v3007_v30  ;;  %v3015_v5 = vand.u32 4294901760, %v3014_v31  ;;  %v8899_v25 = vpack.c.bf16 %v3014_v31, %v3007_v30 }
 0x3ba   : > { %8886 = vmatpush3.bf16.msra.mxu0 %v10237_v29  ;;  %v3022_v12 = vand.u32 4294901760, %v3021_v50  ;;  %v3029_v11 = vand.u32 4294901760, %v3028_v63  ;;  %v8903_v20 = vpack.c.bf16 %v3028_v63, %v3021_v50 }
 0x3bb   : > { %8888 = vmatprep.subr.bf16.mxu0 %v10239_v24  ;;  %v3009_v35 = vsub.f32 %v3007_v30, %v3008_v6  ;;  %v3016_v36 = vsub.f32 %v3014_v31, %v3015_v5  ;;  %v8915_v44 = vpack.c.bf16 %v3015_v5, %v3008_v6  ;;  %v7560_v30 = vld [vmem:[%s9863_s21 + $0x8] sm:$0xf] }
 0x3bc   : > { %v3023_v54 = vsub.f32 %v3021_v50, %v3022_v12  ;;  %v3030_v33 = vsub.f32 %v3028_v63, %v3029_v11  ;;  %v8919_v38 = vpack.c.bf16 %v3029_v11, %v3022_v12  ;;  %v4014_v31 = vsel %vm542_vm0, %v7560_v30, 0  ;;  %v10676_v12 = vld [vmem:[#allocation26_spill] sm:$0xff]  ;;  %v10677_v11 = vld [vmem:[#allocation24_spill] sm:$0xff] }
 0x3bd   : > { %v3010_v1 = vand.u32 4294901760, %v3009_v35  ;;  %v3017_v56 = vand.u32 4294901760, %v3016_v36  ;;  %v4017_v50 = vand.u32 4294901760, %v4014_v31  ;;  %v10679_v35 = vld [vmem:[#allocation27_spill] sm:$0xff]  ;;  %v10680_v36 = vld [vmem:[#allocation28_spill] sm:$0xff] }
 0x3be   : > { %8890 = vmatpush3.bf16.msra.mxu0 %v10239_v24  ;;  %v3024_v19 = vand.u32 4294901760, %v3023_v54  ;;  %v3031_v32 = vand.u32 4294901760, %v3030_v33  ;;  %v10681_v54 = vld [vmem:[#allocation30_spill] sm:$0xff]  ;;  %v10683_v30 = vld [vmem:[#allocation32_spill] sm:$0xff] }
 0x3bf   : > { %v8891_v41 = vpack.c.bf16 %v3017_v56, %v3010_v1  ;;  %v4124_v63 = vsub.f32 %v4014_v31, %v4017_v50  ;;  %v10682_v1 = vld [vmem:[#allocation31_spill] sm:$0xff] }
 0x3c0   : > { %v8895_v47 = vpack.c.bf16 %v3031_v32, %v3024_v19 }
 0x3c1   : > { %8262 = vmatmul.mubr.f32.vlgmr.msra.gmra.mrb[6].mxu0 %v10093_v49  ;;  %8892 = vmatprep.subr.bf16.mxu0 %v8891_v41  ;;  %v4125_v6 = vand.u32 4294901760, %v4124_v63 }
 0x3c2   : > { %8894 = vmatpush3.bf16.msra.mxu0 %v8891_v41  ;;  %8264 = vmatprep.mubr.f32.mxu0 %v10099_v0 }
 0x3c3   : > { %8896 = vmatprep.subr.bf16.mxu0 %v8895_v47  ;;  %v4126_v5 = vsub.f32 %v4124_v63, %v4125_v6 }
 0x3c5   : > { %8265 = vmatmul.mubr.f32.gmra.mrb[8].mxu0 %v10102_v14 }
 0x3c6   : > { %8898 = vmatpush3.bf16.msra.mxu0 %v8895_v47  ;;  %8275 = vmatprep.mubr.f32.mxu0 %v10015_v57 }
 0x3c7   : > { %8900 = vmatprep.subr.bf16.mxu0 %v8899_v25 }
 0x3c9   : > { %8276 = vmatmul.mubr.f32.vlgmr.msra.gmra.mrb[6].mxu0 %v10043_v17 }
 0x3ca   : > { %8902 = vmatpush3.bf16.msra.mxu0 %v8899_v25  ;;  %8278 = vmatprep.mubr.f32.mxu0 %v10050_v28  ;;  %v4127_v25 = vand.u32 4294901760, %v4126_v5  ;;  %v10684_v5 = vld [vmem:[#allocation33_spill] sm:$0xff] }
 0x3cb   : > { %8904 = vmatprep.subr.bf16.mxu0 %v8903_v20 }
 0x3cd   : > { %8279 = vmatmul.mubr.f32.gmra.mrb[8].mxu0 %v10060_v45 }
 0x3ce   : > { %8906 = vmatpush3.bf16.msra.mxu0 %v8903_v20  ;;  %8289 = vmatprep.mubr.f32.mxu0 %v10018_v58  ;;  %v10678_v20 = vld [vmem:[#allocation25_spill] sm:$0xff] }
 0x3cf   : > { %8908 = vmatprep.subr.bf16.mxu0 %v10237_v29 }
 0x3d1   : > { %8290 = vmatmul.mubr.f32.vlgmr.msra.gmra.mrb[6].mxu0 %v10056_v39 }
 0x3d2   : > { %8910 = vmatpush3.bf16.msra.mxu0 %v10237_v29  ;;  %8292 = vmatprep.mubr.f32.mxu0 %v10063_v51 }
 0x3d3   : > { %8912 = vmatprep.subr.bf16.mxu0 %v10239_v24 }
 0x3d5   : > { %8293 = vmatmul.mubr.f32.gmra.mrb[8].mxu0 %v10075_v3 }
 0x3d6   : > { %8914 = vmatpush3.bf16.msra.mxu0 %v10239_v24  ;;  %8303 = vmatprep.mubr.f32.mxu0 %v10021_v59 }
 0x3d7   : > { %8916 = vmatprep.subr.bf16.mxu0 %v8915_v44 }
 0x3d9   : > { %8304 = vmatmul.mubr.f32.vlgmr.msra.gmra.mrb[6].mxu0 %v10071_v62 }
 0x3da   : > { %8918 = vmatpush3.bf16.msra.mxu0 %v8915_v44  ;;  %8306 = vmatprep.mubr.f32.mxu0 %v10078_v9 }
 0x3db   : > { %8920 = vmatprep.subr.bf16.mxu0 %v8919_v38 }
 0x3dd   : > { %8307 = vmatmul.mubr.f32.gmra.mrb[8].mxu0 %v10086_v27 }
 0x3de   : > { %8922 = vmatpush3.bf16.msra.mxu0 %v8919_v38  ;;  %8317 = vmatprep.mubr.f32.mxu0 %v10015_v57 }
 0x3df   : > { %8924 = vmatprep.subr.bf16.mxu0 %v10237_v29 }
 0x3e1   : > { %8318 = vmatmul.mubr.f32.vlgmr.msra.gmra.mrb[6].mxu0 %v10043_v17 }
 0x3e2   : > { %8926 = vmatpush3.bf16.msra.mxu0 %v10237_v29  ;;  %8320 = vmatprep.mubr.f32.mxu0 %v10050_v28  ;;  %v10674_v29 = vld [vmem:[#allocation22_spill] sm:$0xff] }
 0x3e3   : > { %8928 = vmatprep.subr.bf16.mxu0 %v10239_v24 }
 0x3e5   : > { %8321 = vmatmul.mubr.f32.gmra.mrb[8].mxu0 %v10060_v45 }
 0x3e6   : > { %8930 = vmatpush3.bf16.msra.mxu0 %v10239_v24  ;;  %8331 = vmatprep.mubr.f32.mxu0 %v10015_v57  ;;  %v10675_v24 = vld [vmem:[#allocation23_spill] sm:$0xff] }
 0x3e7   : > { %8403 = vmatprep.subr.mxu0 %v4017_v50 }
 0x3e9   : > { %8332 = vmatmul.mubr.f32.vlgmr.msra.gmra.mrb[6].mxu0 %v10043_v17 }
 0x3ea   : > { %8334 = vmatprep.mubr.f32.mxu0 %v10050_v28  ;;  %8404 = vmatpush3.msra.mxu0 %v4017_v50 }
 0x3eb   : > { %8411 = vmatprep.subr.mxu0 %v4127_v25 }
 0x3ed   : > { %8335 = vmatmul.mubr.f32.gmra.mrb[8].mxu0 %v10060_v45 }
 0x3ee   : > { %8405 = vmatprep.mubr.f32.mxu0 %v9958_v42 }
 0x3f1   : > { %8406 = vmatmul.mubr.f32.vlgmr.msra.gmra.mrb[10].mxu0 %v9960_v43 }
 0x3f2   : > { %8408 = vmatprep.mubr.f32.mxu0 %v9964_v46  ;;  %8412 = vmatpush3.msra.mxu0 %v4127_v25 }
 0x3f3   : > { %8419 = vmatprep.subr.mxu0 %v4124_v63 }
 0x3f5   : > { %8409 = vmatmul.mubr.f32.gmra.mrb[12].mxu0 %v9971_v48 }
 0x3f6   : > { %8413 = vmatprep.mubr.f32.mxu0 %v9897_v15 }
 0x3f9   : > { %8414 = vmatmul.mubr.f32.vlgmr.msra.gmra.mrb[10].mxu0 %v9899_v16 }
 0x3fa   : > { %8416 = vmatprep.mubr.f32.mxu0 %v9908_v21  ;;  %8420 = vmatpush3.msra.mxu0 %v4124_v63 }
 0x3fb   : > { %8427 = vmatprep.subr.mxu0 %v4017_v50 }
 0x3fd   : > { %8417 = vmatmul.mubr.f32.gmra.mrb[12].mxu0 %v9919_v26 }
 0x3fe   : > { %8421 = vmatprep.mubr.f32.mxu0 %v9913_v23 }
 0x401   : > { %8422 = vmatmul.mubr.f32.vlgmr.msra.gmra.mrb[10].mxu0 %v10674_v29 }
 0x402   : > { %8424 = vmatprep.mubr.f32.mxu0 %v10675_v24  ;;  %8428 = vmatpush3.msra.mxu0 %v4017_v50 }
 0x403   : > { %8435 = vmatprep.subr.mxu0 %v4125_v6 }
 0x405   : > { %8425 = vmatmul.mubr.f32.gmra.mrb[12].mxu0 %v10676_v12 }
 0x406   : > { %8429 = vmatprep.mubr.f32.mxu0 %v10677_v11 }
 0x409   : > { %8430 = vmatmul.mubr.f32.vlgmr.msra.gmra.mrb[10].mxu0 %v10678_v20 }
 0x40a   : > { %8432 = vmatprep.mubr.f32.mxu0 %v10679_v35  ;;  %8436 = vmatpush3.msra.mxu0 %v4125_v6 }
 0x40b   : > { %8443 = vmatprep.subr.mxu0 %v4017_v50 }
 0x40d   : > { %8433 = vmatmul.mubr.f32.gmra.mrb[12].mxu0 %v10680_v36 }
 0x40e   : > { %8437 = vmatprep.mubr.f32.mxu0 %v9897_v15 }
 0x411   : > { %8438 = vmatmul.mubr.f32.vlgmr.msra.gmra.mrb[10].mxu0 %v9899_v16 }
 0x412   : > { %8440 = vmatprep.mubr.f32.mxu0 %v9908_v21  ;;  %8444 = vmatpush3.msra.mxu0 %v4017_v50 }
 0x413   : > { %9015 = vmatprep.subr.bf16.mxu0 %v10672_v34 }
 0x415   : > { %8441 = vmatmul.mubr.f32.gmra.mrb[12].mxu0 %v9919_v26 }
 0x416   : > { %8445 = vmatprep.mubr.f32.mxu0 %v9897_v15 }
 0x419   : > { %8446 = vmatmul.mubr.f32.vlgmr.msra.gmra.mrb[10].mxu0 %v9899_v16 }
 0x41a   : > { %8448 = vmatprep.mubr.f32.mxu0 %v9908_v21 }
 0x41d   : > { %8449 = vmatmul.mubr.f32.gmra.mrb[12].mxu0 %v9919_v26 }
 0x41e   : > { %8543 = vmatprep.mubr.msk.f32.mxu0 %vm9640_vm4, %v10673_v40 }
 0x4bc   : > { %v8333_v44 = vpop.f32.mrb[6].mxu0 }
 0x4bd   : > { %v9148_v33 = vadd.f32 %v8333_v44, %v10681_v54  ;;  %v3488_v38 = vpop.f32.mrb[7].mxu0 }
 0x4be   : > { %v9149_v56 = vadd.f32 %v3488_v38, %v10682_v1 }
 0x4bf   : > { %v3514_v19 = vand.u32 4294901760, %v9148_v33 }
 0x4c0   : > { %v3511_v32 = vand.u32 4294901760, %v9149_v56  ;;  %v8336_v41 = vpop.f32.mrb[8].mxu0 }
 0x4c1   : > { %v3598_v47 = vsub.f32 %v9148_v33, %v3514_v19  ;;  %v9150_v31 = vadd.f32 %v8336_v41, %v10683_v30  ;;  %v3500_v50 = vpop.f32.mrb[9].mxu0 }
 0x4c2   : > { %v8932_v63 = vpack.c.bf16 %v3514_v19, %v3511_v32  ;;  %v3591_v6 = vsub.f32 %v9149_v56, %v3511_v32  ;;  %v9151_v25 = vadd.f32 %v3500_v50, %v10684_v5 }
 0x4c3   : > { %v3599_v36 = vand.u32 4294901760, %v3598_v47  ;;  %v3520_v35 = vand.u32 4294901760, %v9150_v31 }
 0x4c4   : > { %v3592_v20 = vand.u32 4294901760, %v3591_v6  ;;  %v8944_v11 = vpack.c.bf16 %v3598_v47, %v3591_v6  ;;  %v3517_v12 = vand.u32 4294901760, %v9151_v25  ;;  %8933 = vmatpush3.bf16.msra.mxu1 %v8932_v63 }
 0x4c5   : > { %v3600_v44 = vsub.f32 %v3598_v47, %v3599_v36  ;;  %v3612_v54 = vsub.f32 %v9150_v31, %v3520_v35  ;;  %8934 = vmatprep.subr.bf16.mxu1 %v10672_v34 }
 0x4c6   : > { %v3593_v38 = vsub.f32 %v3591_v6, %v3592_v20  ;;  %v8935_v1 = vpack.c.bf16 %v3520_v35, %v3517_v12  ;;  %v3605_v33 = vsub.f32 %v9151_v25, %v3517_v12  ;;  %v8956_v24 = vpack.c.bf16 %v3599_v36, %v3592_v20 }
 0x4c7   : > { %v3601_v41 = vand.u32 4294901760, %v3600_v44  ;;  %v3613_v30 = vand.u32 4294901760, %v3612_v54 }
 0x4c8   : > { %v3594_v19 = vand.u32 4294901760, %v3593_v38  ;;  %v3606_v56 = vand.u32 4294901760, %v3605_v33  ;;  %v8947_v32 = vpack.c.bf16 %v3612_v54, %v3605_v33  ;;  %8936 = vmatpush3.bf16.msra.mxu1 %v8935_v1 }
 0x4c9   : > { %v3614_v50 = vsub.f32 %v3612_v54, %v3613_v30  ;;  %8937 = vmatprep.subr.bf16.mxu1 %v10672_v34 }
 0x4ca   : > { %v3607_v5 = vsub.f32 %v3605_v33, %v3606_v56  ;;  %v8938_v29 = vpack.c.bf16 %v3601_v41, %v3594_v19  ;;  %v8959_v23 = vpack.c.bf16 %v3613_v30, %v3606_v56 }
 0x4cb   : > { %v3615_v47 = vand.u32 4294901760, %v3614_v50  ;;  %8346 = vmatmul.mubr.f32.vlgmr.msra.gmra.mrb[8].mxu1 %v10193_v37 }
 0x4cc   : > { %v3608_v31 = vand.u32 4294901760, %v3607_v5  ;;  %8939 = vmatpush3.bf16.msra.mxu1 %v8938_v29  ;;  %8356 = vmatprep.mubr.msk.f32.mxu1 %vm9640_vm4, %v10673_v40  ;;  %v10685_v5 = vld [vmem:[#allocation29_spill] sm:$0xff] }
 0x4cd   : > { %8940 = vmatprep.subr.bf16.mxu1 %v10672_v34 }
 0x4ce   : > { %v8941_v12 = vpack.c.bf16 %v3615_v47, %v3608_v31 }
 0x4d0   : > { %8942 = vmatpush3.bf16.msra.mxu1 %v8941_v12 }
 0x4d1   : > { %8943 = vmatprep.subr.bf16.mxu1 %v10672_v34 }
 0x4d3   : > { %8357 = vmatmul.mubr.f32.vlgmr.msra.gmra.mrb[8].mxu1 %v10170_v53 }
 0x4d4   : > { %8945 = vmatpush3.bf16.msra.mxu1 %v8944_v11  ;;  %8367 = vmatprep.mubr.msk.f32.mxu1 %vm9640_vm4, %v10673_v40 }
 0x4d5   : > { %8946 = vmatprep.subr.bf16.mxu1 %v10672_v34 }
 0x4d8   : > { %8948 = vmatpush3.bf16.msra.mxu1 %v8947_v32 }
 0x4d9   : > { %8949 = vmatprep.subr.bf16.mxu1 %v10672_v34 }
 0x4db   : > { %8368 = vmatmul.mubr.f32.vlgmr.msra.gmra.mrb[8].mxu1 %v10177_v60 }
 0x4dc   : > { %8951 = vmatpush3.bf16.msra.mxu1 %v8932_v63  ;;  %8378 = vmatprep.mubr.msk.f32.mxu1 %vm9640_vm4, %v10673_v40 }
 0x4dd   : > { %8952 = vmatprep.subr.bf16.mxu1 %v10672_v34 }
 0x4e0   : > { %8954 = vmatpush3.bf16.msra.mxu1 %v8935_v1 }
 0x4e1   : > { %8955 = vmatprep.subr.bf16.mxu1 %v10672_v34 }
 0x4e3   : > { %8379 = vmatmul.mubr.f32.vlgmr.msra.gmra.mrb[8].mxu1 %v10182_v13 }
 0x4e4   : > { %8957 = vmatpush3.bf16.msra.mxu1 %v8956_v24  ;;  %8389 = vmatprep.mubr.msk.f32.mxu1 %vm9640_vm4, %v10673_v40 }
 0x4e5   : > { %8958 = vmatprep.subr.bf16.mxu1 %v10672_v34 }
 0x4e8   : > { %8960 = vmatpush3.bf16.msra.mxu1 %v8959_v23  ;;  %v7561_v23 = vld [vmem:[%s9866_s10 + $0x2] sm:$0x1] }
 0x4e9   : > { %8961 = vmatprep.subr.bf16.mxu1 %v10672_v34  ;;  %vm4001_vm6 = vcmp.eq.f32.partialorder %v7561_v23, %v7561_v23 }
 0x4eb   : > { %8390 = vmatmul.mubr.f32.vlgmr.msra.gmra.mrb[8].mxu1 %v10170_v53 }
 0x4ec   : > { %8963 = vmatpush3.bf16.msra.mxu1 %v8932_v63  ;;  %8400 = vmatprep.mubr.msk.f32.mxu1 %vm9640_vm4, %v10673_v40  ;;  %v8447_v29 = vpop.f32.mrb[10].mxu0 }
 0x4ed   : > { %8964 = vmatprep.subr.bf16.mxu1 %v10672_v34  ;;  %v4569_v24 = vpop.f32.mrb[11].mxu0 }
 0x4f0   : > { %8966 = vmatpush3.bf16.msra.mxu1 %v8935_v1  ;;  %v8450_v11 = vpop.f32.mrb[12].mxu0 }
 0x4f1   : > { %v4581_v20 = vpop.f32.mrb[13].mxu0 }
 0x4f3   : > { %8401 = vmatmul.mubr.f32.vlgmr.msra.gmra.mrb[8].mxu1 %v10170_v53 }
 0x4f4   : > { %8459 = vmatprep.mubr.f32.mxu1 %v10025_v61 }
 0x5c6   : > { %v3991_v35 = vpop.f32.mrb[8].mxu1 }
 0x5c7   : > { %v9152_v36 = vadd.f32 %v3991_v35, %v10224_v10  ;;  %v8402_v54 = vpop.f32.mrb[9].mxu1 }
 0x5c9   : > { %7559 = vst [vmem:[%s9876_s24 + $0x1] sm:$0x1] %v9152_v36  ;;  %v4002_v30 = vsel %vm4001_vm6, %v7561_v23, %v9152_v36 }
 0x5ca   : > { %v4007_v63 = vrot.slane %v4002_v30, %v10033_v4 }
 0x5cc   : > { %v4009_v6 = vmul.f32 %v4007_v63, %v10031_v2  ;;  %v4010_v1 = vmul.f32 %v4007_v63, %v10037_v8  ;;  %v4011_v25 = vmul.f32 %v4007_v63, %v10685_v5  ;;  %v4012_v44 = vmul.f32 %v4007_v63, %v10035_v7 }
 0x5ce   : > { %v9154_v38 = vadd.f32 %v4569_v24, %v4009_v6  ;;  %v9153_v33 = vadd.f32 %v8447_v29, %v4010_v1  ;;  %v9156_v41 = vadd.f32 %v4581_v20, %v4011_v25  ;;  %v9155_v19 = vadd.f32 %v8450_v11, %v4012_v44 }
 0x5d0   : > { %v4591_v56 = vadd.f32 %v9154_v38, %v10048_v22  ;;  %v4592_v32 = vadd.f32 %v9153_v33, %v10045_v18  ;;  %v4593_v50 = vadd.f32 %v9156_v41, %v10067_v55  ;;  %v4594_v47 = vadd.f32 %v9155_v19, %v10065_v52 }
 0x5d2   : > { %v4595_v31 = vmax.f32 %v4591_v56, 0.0  ;;  %v4596_v12 = vmax.f32 %v4592_v32, 0.0  ;;  %v4597_v23 = vmax.f32 %v4593_v50, 0.0  ;;  %v4598_v35 = vmax.f32 %v4594_v47, 0.0 }
 0x5d4   : > { %v4600_v36 = vand.u32 4294901760, %v4595_v31  ;;  %v4603_v54 = vand.u32 4294901760, %v4596_v12  ;;  %v4606_v30 = vand.u32 4294901760, %v4597_v23  ;;  %v4609_v63 = vand.u32 4294901760, %v4598_v35 }
 0x5d6   : > { %v10349_v24 = vpack.c.bf16 %v4603_v54, %v4600_v36  ;;  %v10351_v29 = vpack.c.bf16 %v4609_v63, %v4606_v30  ;;  %v4710_v11 = vsub.f32 %v4595_v31, %v4600_v36  ;;  %v4717_v20 = vsub.f32 %v4596_v12, %v4603_v54 }
 0x5d7   : > { %v4724_v6 = vsub.f32 %v4597_v23, %v4606_v30  ;;  %v4731_v1 = vsub.f32 %v4598_v35, %v4609_v63 }
 0x5d8   : > { %8968 = vmatprep.subr.bf16.mxu1 %v10349_v24  ;;  %v4711_v25 = vand.u32 4294901760, %v4710_v11  ;;  %v4718_v44 = vand.u32 4294901760, %v4717_v20  ;;  %v8983_v38 = vpack.c.bf16 %v4717_v20, %v4710_v11 }
 0x5d9   : > { %8970 = vmatpush3.bf16.msra.mxu1 %v10349_v24  ;;  %v4725_v33 = vand.u32 4294901760, %v4724_v6  ;;  %v4732_v41 = vand.u32 4294901760, %v4731_v1  ;;  %v8987_v19 = vpack.c.bf16 %v4731_v1, %v4724_v6 }
 0x5da   : > { %8972 = vmatprep.subr.bf16.mxu1 %v10351_v29  ;;  %v4712_v56 = vsub.f32 %v4710_v11, %v4711_v25  ;;  %v4719_v32 = vsub.f32 %v4717_v20, %v4718_v44  ;;  %v8999_v50 = vpack.c.bf16 %v4718_v44, %v4711_v25  ;;  %v7563_v11 = vld [vmem:[%s9863_s21 + $0xc] sm:$0xf]  ;;  %s10698_s21 = sld [smem:[#allocation15_spill]] }
 0x5db   : > { %v4726_v47 = vsub.f32 %v4724_v6, %v4725_v33  ;;  %v4733_v31 = vsub.f32 %v4731_v1, %v4732_v41  ;;  %v9003_v12 = vpack.c.bf16 %v4732_v41, %v4725_v33  ;;  %v5717_v20 = vsel %vm542_vm0, %v7563_v11, 0  ;;  %v10692_v33 = vld [vmem:[#allocation27_spill] sm:$0xff]  ;;  %v10693_v41 = vld [vmem:[#allocation28_spill] sm:$0xff] }
 0x5dc   : > { %v4713_v23 = vand.u32 4294901760, %v4712_v56  ;;  %v4720_v35 = vand.u32 4294901760, %v4719_v32  ;;  %v5720_v6 = vand.u32 4294901760, %v5717_v20  ;;  %v10694_v56 = vld [vmem:[#allocation30_spill] sm:$0xff] }
 0x5dd   : > { %8974 = vmatpush3.bf16.msra.mxu1 %v10351_v29  ;;  %v4727_v36 = vand.u32 4294901760, %v4726_v47  ;;  %v4734_v54 = vand.u32 4294901760, %v4733_v31  ;;  %v10695_v47 = vld [vmem:[#allocation31_spill] sm:$0xff] }
 0x5de   : > { %v8975_v30 = vpack.c.bf16 %v4720_v35, %v4713_v23  ;;  %v5827_v1 = vsub.f32 %v5717_v20, %v5720_v6 }
 0x5df   : > { %v8979_v63 = vpack.c.bf16 %v4734_v54, %v4727_v36 }
 0x5e0   : > { %8460 = vmatmul.mubr.f32.vlgmr.msra.gmra.mrb[10].mxu1 %v10093_v49  ;;  %8976 = vmatprep.subr.bf16.mxu1 %v8975_v30  ;;  %v5828_v25 = vand.u32 4294901760, %v5827_v1  ;;  %s7417_s23 = sadd.s32 %s10698_s21, %s7574_s11 }
 0x5e1   : > { %8978 = vmatpush3.bf16.msra.mxu1 %v8975_v30  ;;  %8462 = vmatprep.mubr.f32.mxu1 %v10099_v0  ;;  %s7569_s29 = sshll.u32 %s7417_s23, 4 }
 0x5e2   : > { %8980 = vmatprep.subr.bf16.mxu1 %v8979_v63  ;;  %v5829_v44 = vsub.f32 %v5827_v1, %v5828_v25  ;;  %s10529_s30 = scalar_lea.hbm %s10700_s26, %s7569_s29 }
 0x5e4   : > { %8463 = vmatmul.mubr.f32.gmra.mrb[12].mxu1 %v10102_v14 }
 0x5e5   : > { %8982 = vmatpush3.bf16.msra.mxu1 %v8979_v63  ;;  %8473 = vmatprep.mubr.f32.mxu1 %v10015_v57  ;;  %v10697_v63 = vld [vmem:[#allocation33_spill] sm:$0xff] }
 0x5e6   : > { %8984 = vmatprep.subr.bf16.mxu1 %v8983_v38 }
 0x5e8   : > { %8474 = vmatmul.mubr.f32.vlgmr.msra.gmra.mrb[10].mxu1 %v10043_v17 }
 0x5e9   : > { %8986 = vmatpush3.bf16.msra.mxu1 %v8983_v38  ;;  %8476 = vmatprep.mubr.f32.mxu1 %v10050_v28  ;;  %v5830_v38 = vand.u32 4294901760, %v5829_v44 }
 0x5ea   : > { %8988 = vmatprep.subr.bf16.mxu1 %v8987_v19 }
 0x5ec   : > { %8477 = vmatmul.mubr.f32.gmra.mrb[12].mxu1 %v10060_v45 }
 0x5ed   : > { %8990 = vmatpush3.bf16.msra.mxu1 %v8987_v19  ;;  %8487 = vmatprep.mubr.f32.mxu1 %v10018_v58 }
 0x5ee   : > { %8992 = vmatprep.subr.bf16.mxu1 %v10349_v24 }
 0x5f0   : > { %8488 = vmatmul.mubr.f32.vlgmr.msra.gmra.mrb[10].mxu1 %v10056_v39 }
 0x5f1   : > { %8994 = vmatpush3.bf16.msra.mxu1 %v10349_v24  ;;  %8490 = vmatprep.mubr.f32.mxu1 %v10063_v51 }
 0x5f2   : > { %8996 = vmatprep.subr.bf16.mxu1 %v10351_v29 }
 0x5f4   : > { %8491 = vmatmul.mubr.f32.gmra.mrb[12].mxu1 %v10075_v3 }
 0x5f5   : > { %8998 = vmatpush3.bf16.msra.mxu1 %v10351_v29  ;;  %8501 = vmatprep.mubr.f32.mxu1 %v10021_v59 }
 0x5f6   : > { %9000 = vmatprep.subr.bf16.mxu1 %v8999_v50 }
 0x5f8   : > { %8502 = vmatmul.mubr.f32.vlgmr.msra.gmra.mrb[10].mxu1 %v10071_v62 }
 0x5f9   : > { %9002 = vmatpush3.bf16.msra.mxu1 %v8999_v50  ;;  %8504 = vmatprep.mubr.f32.mxu1 %v10078_v9 }
 0x5fa   : > { %9004 = vmatprep.subr.bf16.mxu1 %v9003_v12 }
 0x5fc   : > { %8505 = vmatmul.mubr.f32.gmra.mrb[12].mxu1 %v10086_v27 }
 0x5fd   : > { %9006 = vmatpush3.bf16.msra.mxu1 %v9003_v12  ;;  %8515 = vmatprep.mubr.f32.mxu1 %v10015_v57 }
 0x5fe   : > { %9008 = vmatprep.subr.bf16.mxu1 %v10349_v24 }
 0x600   : > { %8516 = vmatmul.mubr.f32.vlgmr.msra.gmra.mrb[10].mxu1 %v10043_v17 }
 0x601   : > { %9010 = vmatpush3.bf16.msra.mxu1 %v10349_v24  ;;  %8518 = vmatprep.mubr.f32.mxu1 %v10050_v28  ;;  %v10686_v24 = vld [vmem:[#allocation21_spill] sm:$0xff] }
 0x602   : > { %9012 = vmatprep.subr.bf16.mxu1 %v10351_v29 }
 0x604   : > { %8519 = vmatmul.mubr.f32.gmra.mrb[12].mxu1 %v10060_v45 }
 0x605   : > { %9014 = vmatpush3.bf16.msra.mxu1 %v10351_v29  ;;  %8529 = vmatprep.mubr.f32.mxu1 %v10015_v57  ;;  %v10691_v29 = vld [vmem:[#allocation25_spill] sm:$0xff] }
 0x606   : > { %8601 = vmatprep.subr.mxu1 %v5720_v6 }
 0x608   : > { %8530 = vmatmul.mubr.f32.vlgmr.msra.gmra.mrb[10].mxu1 %v10043_v17 }
 0x609   : > { %8532 = vmatprep.mubr.f32.mxu1 %v10050_v28  ;;  %8602 = vmatpush3.msra.mxu1 %v5720_v6 }
 0x60a   : > { %8609 = vmatprep.subr.mxu1 %v5830_v38 }
 0x60c   : > { %8533 = vmatmul.mubr.f32.gmra.mrb[12].mxu1 %v10060_v45 }
 0x60d   : > { %8603 = vmatprep.mubr.f32.mxu1 %v9958_v42  ;;  %v10687_v42 = vld [vmem:[#allocation22_spill] sm:$0xff] }
 0x610   : > { %8604 = vmatmul.mubr.f32.vlgmr.msra.gmra.mrb[14].mxu1 %v9960_v43  ;;  %v10688_v43 = vld [vmem:[#allocation23_spill] sm:$0xff] }
 0x611   : > { %8606 = vmatprep.mubr.f32.mxu1 %v9964_v46  ;;  %8610 = vmatpush3.msra.mxu1 %v5830_v38  ;;  %v10689_v46 = vld [vmem:[#allocation26_spill] sm:$0xff] }
 0x612   : > { %8617 = vmatprep.subr.mxu1 %v5827_v1 }
 0x614   : > { %8607 = vmatmul.mubr.f32.gmra.mrb[16].mxu1 %v9971_v48  ;;  %v10690_v48 = vld [vmem:[#allocation24_spill] sm:$0xff] }
 0x615   : > { %8611 = vmatprep.mubr.f32.mxu1 %v9897_v15 }
 0x618   : > { %8612 = vmatmul.mubr.f32.vlgmr.msra.gmra.mrb[14].mxu1 %v9899_v16 }
 0x619   : > { %8614 = vmatprep.mubr.f32.mxu1 %v9908_v21  ;;  %8618 = vmatpush3.msra.mxu1 %v5827_v1 }
 0x61a   : > { %8625 = vmatprep.subr.mxu1 %v5720_v6 }
 0x61c   : > { %8615 = vmatmul.mubr.f32.gmra.mrb[16].mxu1 %v9919_v26 }
 0x61d   : > { %8619 = vmatprep.mubr.f32.mxu1 %v10686_v24 }
 0x620   : > { %8620 = vmatmul.mubr.f32.vlgmr.msra.gmra.mrb[14].mxu1 %v10687_v42 }
 0x621   : > { %8622 = vmatprep.mubr.f32.mxu1 %v10688_v43  ;;  %8626 = vmatpush3.msra.mxu1 %v5720_v6 }
 0x622   : > { %8633 = vmatprep.subr.mxu1 %v5828_v25 }
 0x624   : > { %8623 = vmatmul.mubr.f32.gmra.mrb[16].mxu1 %v10689_v46 }
 0x625   : > { %8627 = vmatprep.mubr.f32.mxu1 %v10690_v48 }
 0x628   : > { %8628 = vmatmul.mubr.f32.vlgmr.msra.gmra.mrb[14].mxu1 %v10691_v29 }
 0x629   : > { %8630 = vmatprep.mubr.f32.mxu1 %v10692_v33  ;;  %8634 = vmatpush3.msra.mxu1 %v5828_v25 }
 0x62a   : > { %8641 = vmatprep.subr.mxu1 %v5720_v6 }
 0x62c   : > { %8631 = vmatmul.mubr.f32.gmra.mrb[16].mxu1 %v10693_v41 }
 0x62d   : > { %8635 = vmatprep.mubr.f32.mxu1 %v9897_v15 }
 0x630   : > { %8636 = vmatmul.mubr.f32.vlgmr.msra.gmra.mrb[14].mxu1 %v9899_v16 }
 0x631   : > { %8638 = vmatprep.mubr.f32.mxu1 %v9908_v21  ;;  %8642 = vmatpush3.msra.mxu1 %v5720_v6 }
 0x632   : > { %9099 = vmatprep.subr.bf16.mxu1 %v10672_v34 }
 0x634   : > { %8639 = vmatmul.mubr.f32.gmra.mrb[16].mxu1 %v9919_v26 }
 0x635   : > { %8643 = vmatprep.mubr.f32.mxu1 %v9897_v15  ;;  %v10696_v15 = vld [vmem:[#allocation32_spill] sm:$0xff] }
 0x638   : > { %8644 = vmatmul.mubr.f32.vlgmr.msra.gmra.mrb[14].mxu1 %v9899_v16 }
 0x639   : > { %8646 = vmatprep.mubr.f32.mxu1 %v9908_v21 }
 0x63c   : > { %8647 = vmatmul.mubr.f32.gmra.mrb[16].mxu1 %v9919_v26 }
 0x63d   : > { %8741 = vmatprep.mubr.msk.f32.mxu1 %vm9640_vm4, %v10673_v40 }
 0x6db   : > { %v8531_v19 = vpop.f32.mrb[10].mxu1 }
 0x6dc   : > { %v9157_v32 = vadd.f32 %v8531_v19, %v10694_v56  ;;  %v5191_v50 = vpop.f32.mrb[11].mxu1 }
 0x6dd   : > { %v9158_v31 = vadd.f32 %v5191_v50, %v10695_v47 }
 0x6de   : > { %v5217_v12 = vand.u32 4294901760, %v9157_v32 }
 0x6df   : > { %v5214_v23 = vand.u32 4294901760, %v9158_v31  ;;  %v8534_v35 = vpop.f32.mrb[12].mxu1 }
 0x6e0   : > { %v5301_v36 = vsub.f32 %v9157_v32, %v5217_v12  ;;  %v9159_v54 = vadd.f32 %v8534_v35, %v10696_v15  ;;  %v5203_v16 = vpop.f32.mrb[13].mxu1 }
 0x6e1   : > { %v9016_v30 = vpack.c.bf16 %v5217_v12, %v5214_v23  ;;  %v5294_v21 = vsub.f32 %v9158_v31, %v5214_v23  ;;  %v9160_v26 = vadd.f32 %v5203_v16, %v10697_v63 }
 0x6e2   : > { %v5302_v11 = vand.u32 4294901760, %v5301_v36  ;;  %v5223_v20 = vand.u32 4294901760, %v9159_v54 }
 0x6e3   : > { %v5295_v6 = vand.u32 4294901760, %v5294_v21  ;;  %v9028_v1 = vpack.c.bf16 %v5301_v36, %v5294_v21  ;;  %v5220_v25 = vand.u32 4294901760, %v9160_v26  ;;  %9017 = vmatpush3.bf16.msra.mxu0 %v9016_v30 }
 0x6e4   : > { %v5303_v44 = vsub.f32 %v5301_v36, %v5302_v11  ;;  %v5315_v38 = vsub.f32 %v9159_v54, %v5223_v20  ;;  %9018 = vmatprep.subr.bf16.mxu0 %v10672_v34 }
 0x6e5   : > { %v5296_v24 = vsub.f32 %v5294_v21, %v5295_v6  ;;  %v9019_v42 = vpack.c.bf16 %v5223_v20, %v5220_v25  ;;  %v5308_v43 = vsub.f32 %v9160_v26, %v5220_v25  ;;  %v9040_v46 = vpack.c.bf16 %v5302_v11, %v5295_v6  ;;  %v7564_v11 = vld [vmem:[%s9866_s10 + $0x3] sm:$0x1]  ;;  %s10699_s10 = sld [smem:[#allocation18_spill]] }
 0x6e6   : > { %v5304_v48 = vand.u32 4294901760, %v5303_v44  ;;  %v5316_v29 = vand.u32 4294901760, %v5315_v38  ;;  %vm5704_vm7 = vcmp.eq.f32.partialorder %v7564_v11, %v7564_v11 }
 0x6e7   : > { %v5297_v33 = vand.u32 4294901760, %v5296_v24  ;;  %v5309_v41 = vand.u32 4294901760, %v5308_v43  ;;  %v9031_v19 = vpack.c.bf16 %v5315_v38, %v5308_v43  ;;  %9020 = vmatpush3.bf16.msra.mxu0 %v9019_v42 }
 0x6e8   : > { %v5317_v32 = vsub.f32 %v5315_v38, %v5316_v29  ;;  %9021 = vmatprep.subr.bf16.mxu0 %v10672_v34 }
 0x6e9   : > { %v5310_v50 = vsub.f32 %v5308_v43, %v5309_v41  ;;  %v9022_v31 = vpack.c.bf16 %v5304_v48, %v5297_v33  ;;  %v9043_v12 = vpack.c.bf16 %v5316_v29, %v5309_v41 }
 0x6ea   : > { %v5318_v23 = vand.u32 4294901760, %v5317_v32  ;;  %8544 = vmatmul.mubr.f32.vlgmr.msra.gmra.mrb[14].mxu0 %v10193_v37 }
 0x6eb   : > { %v5311_v35 = vand.u32 4294901760, %v5310_v50  ;;  %9023 = vmatpush3.bf16.msra.mxu0 %v9022_v31  ;;  %8554 = vmatprep.mubr.msk.f32.mxu0 %vm9640_vm4, %v10673_v40  ;;  %p10701_p11 = scmp.ne.s32.totalorder %s10699_s10, 0 }
 0x6ec   : > { %9024 = vmatprep.subr.bf16.mxu0 %v10672_v34 }
 0x6ed   : > { %v9025_v36 = vpack.c.bf16 %v5318_v23, %v5311_v35  ;;  %p9528_p12 = pnand %p9527_p7, %p10701_p11 }
 0x6ef   : > { %9026 = vmatpush3.bf16.msra.mxu0 %v9025_v36  ;;  %p9529_p0 = pneg %p9528_p12 }
 0x6f0   : > { %9027 = vmatprep.subr.bf16.mxu0 %v10672_v34 }
 0x6f1   : > { %p9536_p3 = pnand %p9535_p10, %p9529_p0 }
 0x6f2   : > { %8555 = vmatmul.mubr.f32.vlgmr.msra.gmra.mrb[14].mxu0 %v10170_v53 }
 0x6f3   : > { %9029 = vmatpush3.bf16.msra.mxu0 %v9028_v1  ;;  %8565 = vmatprep.mubr.msk.f32.mxu0 %vm9640_vm4, %v10673_v40 }
 0x6f4   : > { %9030 = vmatprep.subr.bf16.mxu0 %v10672_v34 }
 0x6f7   : > { %9032 = vmatpush3.bf16.msra.mxu0 %v9031_v19 }
 0x6f8   : > { %9033 = vmatprep.subr.bf16.mxu0 %v10672_v34 }
 0x6fa   : > { %8566 = vmatmul.mubr.f32.vlgmr.msra.gmra.mrb[14].mxu0 %v10177_v60 }
 0x6fb   : > { %9035 = vmatpush3.bf16.msra.mxu0 %v9016_v30  ;;  %8576 = vmatprep.mubr.msk.f32.mxu0 %vm9640_vm4, %v10673_v40 }
 0x6fc   : > { %9036 = vmatprep.subr.bf16.mxu0 %v10672_v34 }
 0x6ff   : > { %9038 = vmatpush3.bf16.msra.mxu0 %v9019_v42 }
 0x700   : > { %9039 = vmatprep.subr.bf16.mxu0 %v10672_v34 }
 0x702   : > { %8577 = vmatmul.mubr.f32.vlgmr.msra.gmra.mrb[14].mxu0 %v10182_v13 }
 0x703   : > { %9041 = vmatpush3.bf16.msra.mxu0 %v9040_v46  ;;  %8587 = vmatprep.mubr.msk.f32.mxu0 %vm9640_vm4, %v10673_v40 }
 0x704   : > { %9042 = vmatprep.subr.bf16.mxu0 %v10672_v34 }
 0x707   : > { %9044 = vmatpush3.bf16.msra.mxu0 %v9043_v12 }
 0x708   : > { %9045 = vmatprep.subr.bf16.mxu0 %v10672_v34 }
 0x70a   : > { %8588 = vmatmul.mubr.f32.vlgmr.msra.gmra.mrb[14].mxu0 %v10170_v53 }
 0x70b   : > { %9047 = vmatpush3.bf16.msra.mxu0 %v9016_v30  ;;  %8598 = vmatprep.mubr.msk.f32.mxu0 %vm9640_vm4, %v10673_v40  ;;  %v8645_v54 = vpop.f32.mrb[14].mxu1 }
 0x70c   : > { %9048 = vmatprep.subr.bf16.mxu0 %v10672_v34  ;;  %v6272_v16 = vpop.f32.mrb[15].mxu1 }
 0x70f   : > { %9050 = vmatpush3.bf16.msra.mxu0 %v9019_v42  ;;  %v8648_v21 = vpop.f32.mrb[16].mxu1 }
 0x710   : > { %v6284_v26 = vpop.f32.mrb[17].mxu1 }
 0x712   : > { %8599 = vmatmul.mubr.f32.vlgmr.msra.gmra.mrb[14].mxu0 %v10170_v53 }
 0x713   : > { %8657 = vmatprep.mubr.f32.mxu0 %v10025_v61 }
 0x7e5   : > { %v5694_v20 = vpop.f32.mrb[14].mxu0 }
 0x7e6   : > { %v9161_v6 = vadd.f32 %v5694_v20, %v10224_v10  ;;  %v8600_v30 = vpop.f32.mrb[15].mxu0 }
 0x7e8   : > { %7562 = vst [vmem:[%s9876_s24 + $0x2] sm:$0x1] %v9161_v6  ;;  %v5705_v1 = vsel %vm5704_vm7, %v7564_v11, %v9161_v6 }
 0x7e9   : > { %v5710_v25 = vrot.slane %v5705_v1, %v10033_v4 }
 0x7eb   : > { %v5712_v44 = vmul.f32 %v5710_v25, %v10031_v2  ;;  %v5713_v38 = vmul.f32 %v5710_v25, %v10037_v8  ;;  %v5714_v24 = vmul.f32 %v5710_v25, %v10685_v5  ;;  %v5715_v42 = vmul.f32 %v5710_v25, %v10035_v7 }
 0x7ed   : > { %v9163_v43 = vadd.f32 %v6272_v16, %v5712_v44  ;;  %v9162_v61 = vadd.f32 %v8645_v54, %v5713_v38  ;;  %v9165_v46 = vadd.f32 %v6284_v26, %v5714_v24  ;;  %v9164_v48 = vadd.f32 %v8648_v21, %v5715_v42 }
 0x7ef   : > { %v6294_v29 = vadd.f32 %v9163_v43, %v10048_v22  ;;  %v6295_v33 = vadd.f32 %v9162_v61, %v10045_v18  ;;  %v6296_v41 = vadd.f32 %v9165_v46, %v10067_v55  ;;  %v6297_v4 = vadd.f32 %v9164_v48, %v10065_v52 }
 0x7f1   : > { %v6298_v19 = vmax.f32 %v6294_v29, 0.0  ;;  %v6299_v2 = vmax.f32 %v6295_v33, 0.0  ;;  %v6300_v32 = vmax.f32 %v6296_v41, 0.0  ;;  %v6301_v8 = vmax.f32 %v6297_v4, 0.0 }
 0x7f3   : > { %v6303_v50 = vand.u32 4294901760, %v6298_v19  ;;  %v6306_v5 = vand.u32 4294901760, %v6299_v2  ;;  %v6309_v31 = vand.u32 4294901760, %v6300_v32  ;;  %v6312_v7 = vand.u32 4294901760, %v6301_v8 }
 0x7f5   : > { %v9051_v12 = vpack.c.bf16 %v6306_v5, %v6303_v50  ;;  %v10461_v23 = vpack.c.bf16 %v6312_v7, %v6309_v31  ;;  %v6413_v35 = vsub.f32 %v6298_v19, %v6303_v50  ;;  %v6420_v36 = vsub.f32 %v6299_v2, %v6306_v5 }
 0x7f6   : > { %v6427_v22 = vsub.f32 %v6300_v32, %v6309_v31  ;;  %v6434_v54 = vsub.f32 %v6301_v8, %v6312_v7 }
 0x7f7   : > { %9052 = vmatprep.subr.bf16.mxu0 %v9051_v12  ;;  %v6414_v18 = vand.u32 4294901760, %v6413_v35  ;;  %v6421_v55 = vand.u32 4294901760, %v6420_v36  ;;  %v9067_v16 = vpack.c.bf16 %v6420_v36, %v6413_v35 }
 0x7f8   : > { %9054 = vmatpush3.bf16.msra.mxu0 %v9051_v12  ;;  %v6428_v52 = vand.u32 4294901760, %v6427_v22  ;;  %v6435_v21 = vand.u32 4294901760, %v6434_v54  ;;  %v9071_v26 = vpack.c.bf16 %v6434_v54, %v6427_v22 }
 0x7f9   : > { %9056 = vmatprep.subr.bf16.mxu0 %v10461_v23  ;;  %v6415_v11 = vsub.f32 %v6413_v35, %v6414_v18  ;;  %v6422_v20 = vsub.f32 %v6420_v36, %v6421_v55  ;;  %v9083_v6 = vpack.c.bf16 %v6421_v55, %v6414_v18 }
 0x7fa   : > { %v6429_v30 = vsub.f32 %v6427_v22, %v6428_v52  ;;  %v6436_v1 = vsub.f32 %v6434_v54, %v6435_v21  ;;  %v9087_v25 = vpack.c.bf16 %v6435_v21, %v6428_v52 }
 0x7fb   : > { %v6416_v44 = vand.u32 4294901760, %v6415_v11  ;;  %v6423_v38 = vand.u32 4294901760, %v6422_v20 }
 0x7fc   : > { %9058 = vmatpush3.bf16.msra.mxu0 %v10461_v23  ;;  %v6430_v24 = vand.u32 4294901760, %v6429_v30  ;;  %v6437_v42 = vand.u32 4294901760, %v6436_v1 }
 0x7fd   : > { %v9059_v43 = vpack.c.bf16 %v6423_v38, %v6416_v44 }
 0x7fe   : > { %v9063_v61 = vpack.c.bf16 %v6437_v42, %v6430_v24 }
 0x7ff   : > { %8658 = vmatmul.mubr.f32.vlgmr.msra.gmra.mrb[16].mxu0 %v10093_v49  ;;  %9060 = vmatprep.subr.bf16.mxu0 %v9059_v43 }
 0x800   : > { %9062 = vmatpush3.bf16.msra.mxu0 %v9059_v43  ;;  %8660 = vmatprep.mubr.f32.mxu0 %v10099_v0 }
 0x801   : > { %9064 = vmatprep.subr.bf16.mxu0 %v9063_v61 }
 0x803   : > { %8661 = vmatmul.mubr.f32.gmra.mrb[18].mxu0 %v10102_v14 }
 0x804   : > { %9066 = vmatpush3.bf16.msra.mxu0 %v9063_v61  ;;  %8671 = vmatprep.mubr.f32.mxu0 %v10015_v57 }
 0x805   : > { %9068 = vmatprep.subr.bf16.mxu0 %v9067_v16 }
 0x807   : > { %8672 = vmatmul.mubr.f32.vlgmr.msra.gmra.mrb[16].mxu0 %v10043_v17 }
 0x808   : > { %9070 = vmatpush3.bf16.msra.mxu0 %v9067_v16  ;;  %8674 = vmatprep.mubr.f32.mxu0 %v10050_v28 }
 0x809   : > { %9072 = vmatprep.subr.bf16.mxu0 %v9071_v26 }
 0x80b   : > { %8675 = vmatmul.mubr.f32.gmra.mrb[18].mxu0 %v10060_v45 }
 0x80c   : > { %9074 = vmatpush3.bf16.msra.mxu0 %v9071_v26  ;;  %8685 = vmatprep.mubr.f32.mxu0 %v10018_v58 }
 0x80d   : > { %9076 = vmatprep.subr.bf16.mxu0 %v9051_v12 }
 0x80f   : > { %8686 = vmatmul.mubr.f32.vlgmr.msra.gmra.mrb[16].mxu0 %v10056_v39 }
 0x810   : > { %9078 = vmatpush3.bf16.msra.mxu0 %v9051_v12  ;;  %8688 = vmatprep.mubr.f32.mxu0 %v10063_v51 }
 0x811   : > { %9080 = vmatprep.subr.bf16.mxu0 %v10461_v23 }
 0x813   : > { %8689 = vmatmul.mubr.f32.gmra.mrb[18].mxu0 %v10075_v3 }
 0x814   : > { %9082 = vmatpush3.bf16.msra.mxu0 %v10461_v23  ;;  %8699 = vmatprep.mubr.f32.mxu0 %v10021_v59 }
 0x815   : > { %9084 = vmatprep.subr.bf16.mxu0 %v9083_v6 }
 0x817   : > { %8700 = vmatmul.mubr.f32.vlgmr.msra.gmra.mrb[16].mxu0 %v10071_v62 }
 0x818   : > { %9086 = vmatpush3.bf16.msra.mxu0 %v9083_v6  ;;  %8702 = vmatprep.mubr.f32.mxu0 %v10078_v9 }
 0x819   : > { %9088 = vmatprep.subr.bf16.mxu0 %v9087_v25 }
 0x81b   : > { %8703 = vmatmul.mubr.f32.gmra.mrb[18].mxu0 %v10086_v27 }
 0x81c   : > { %9090 = vmatpush3.bf16.msra.mxu0 %v9087_v25  ;;  %8713 = vmatprep.mubr.f32.mxu0 %v10015_v57 }
 0x81d   : > { %9092 = vmatprep.subr.bf16.mxu0 %v9051_v12 }
 0x81f   : > { %8714 = vmatmul.mubr.f32.vlgmr.msra.gmra.mrb[16].mxu0 %v10043_v17 }
 0x820   : > { %9094 = vmatpush3.bf16.msra.mxu0 %v9051_v12  ;;  %8716 = vmatprep.mubr.f32.mxu0 %v10050_v28 }
 0x821   : > { %9096 = vmatprep.subr.bf16.mxu0 %v10461_v23 }
 0x823   : > { %8717 = vmatmul.mubr.f32.gmra.mrb[18].mxu0 %v10060_v45 }
 0x824   : > { %9098 = vmatpush3.bf16.msra.mxu0 %v10461_v23  ;;  %8727 = vmatprep.mubr.f32.mxu0 %v10015_v57 }
 0x827   : > { %8728 = vmatmul.mubr.f32.vlgmr.msra.gmra.mrb[16].mxu0 %v10043_v17 }
 0x828   : > { %8730 = vmatprep.mubr.f32.mxu0 %v10050_v28 }
 0x82b   : > { %8731 = vmatmul.mubr.f32.gmra.mrb[18].mxu0 %v10060_v45 }
 0x8fa   : > { %v8729_v58 = vpop.f32.mrb[16].mxu0 }
 0x8fb   : > { %v9166_v59 = vadd.f32 %v8729_v58, %v10694_v56  ;;  %v6894_v39 = vpop.f32.mrb[17].mxu0 }
 0x8fc   : > { %v9167_v51 = vadd.f32 %v6894_v39, %v10695_v47 }
 0x8fd   : > { %v6920_v62 = vand.u32 4294901760, %v9166_v59 }
 0x8fe   : > { %v6917_v3 = vand.u32 4294901760, %v9167_v51  ;;  %v8732_v9 = vpop.f32.mrb[18].mxu0 }
 0x8ff   : > { %v7004_v27 = vsub.f32 %v9166_v59, %v6920_v62  ;;  %v9168_v49 = vadd.f32 %v8732_v9, %v10696_v15  ;;  %v6906_v0 = vpop.f32.mrb[19].mxu0 }
 0x900   : > { %v9100_v57 = vpack.c.bf16 %v6920_v62, %v6917_v3  ;;  %v6997_v14 = vsub.f32 %v9167_v51, %v6917_v3  ;;  %v9169_v17 = vadd.f32 %v6906_v0, %v10697_v63 }
 0x901   : > { %v7005_v28 = vand.u32 4294901760, %v7004_v27  ;;  %v6926_v46 = vand.u32 4294901760, %v9168_v49 }
 0x902   : > { %v6998_v45 = vand.u32 4294901760, %v6997_v14  ;;  %v9112_v48 = vpack.c.bf16 %v7004_v27, %v6997_v14  ;;  %v6923_v29 = vand.u32 4294901760, %v9169_v17  ;;  %9101 = vmatpush3.bf16.msra.mxu1 %v9100_v57 }
 0x903   : > { %v7006_v56 = vsub.f32 %v7004_v27, %v7005_v28  ;;  %v7018_v33 = vsub.f32 %v9168_v49, %v6926_v46  ;;  %9102 = vmatprep.subr.bf16.mxu1 %v10672_v34 }
 0x904   : > { %v6999_v47 = vsub.f32 %v6997_v14, %v6998_v45  ;;  %v9103_v41 = vpack.c.bf16 %v6926_v46, %v6923_v29  ;;  %v7011_v4 = vsub.f32 %v9169_v17, %v6923_v29  ;;  %v9124_v19 = vpack.c.bf16 %v7005_v28, %v6998_v45 }
 0x905   : > { %v7007_v15 = vand.u32 4294901760, %v7006_v56  ;;  %v7019_v2 = vand.u32 4294901760, %v7018_v33 }
 0x906   : > { %v7000_v32 = vand.u32 4294901760, %v6999_v47  ;;  %v7012_v8 = vand.u32 4294901760, %v7011_v4  ;;  %v9115_v50 = vpack.c.bf16 %v7018_v33, %v7011_v4  ;;  %9104 = vmatpush3.bf16.msra.mxu1 %v9103_v41 }
 0x907   : > { %v7020_v63 = vsub.f32 %v7018_v33, %v7019_v2  ;;  %9105 = vmatprep.subr.bf16.mxu1 %v10672_v34 }
 0x908   : > { %v7013_v5 = vsub.f32 %v7011_v4, %v7012_v8  ;;  %v9106_v31 = vpack.c.bf16 %v7007_v15, %v7000_v32  ;;  %v9127_v7 = vpack.c.bf16 %v7019_v2, %v7012_v8 }
 0x909   : > { %v7021_v12 = vand.u32 4294901760, %v7020_v63  ;;  %8742 = vmatmul.mubr.f32.vlgmr.msra.gmra.mrb[18].mxu1 %v10193_v37 }
 0x90a   : > { %v7014_v23 = vand.u32 4294901760, %v7013_v5  ;;  %9107 = vmatpush3.bf16.msra.mxu1 %v9106_v31  ;;  %8752 = vmatprep.mubr.msk.f32.mxu1 %vm9640_vm4, %v10673_v40 }
 0x90b   : > { %9108 = vmatprep.subr.bf16.mxu1 %v10672_v34 }
 0x90c   : > { %v9109_v35 = vpack.c.bf16 %v7021_v12, %v7014_v23 }
 0x90e   : > { %9110 = vmatpush3.bf16.msra.mxu1 %v9109_v35 }
 0x90f   : > { %9111 = vmatprep.subr.bf16.mxu1 %v10672_v34 }
 0x911   : > { %8753 = vmatmul.mubr.f32.vlgmr.msra.gmra.mrb[18].mxu1 %v10170_v53 }
 0x912   : > { %9113 = vmatpush3.bf16.msra.mxu1 %v9112_v48  ;;  %8763 = vmatprep.mubr.msk.f32.mxu1 %vm9640_vm4, %v10673_v40 }
 0x913   : > { %9114 = vmatprep.subr.bf16.mxu1 %v10672_v34 }
 0x916   : > { %9116 = vmatpush3.bf16.msra.mxu1 %v9115_v50 }
 0x917   : > { %9117 = vmatprep.subr.bf16.mxu1 %v10672_v34 }
 0x919   : > { %8764 = vmatmul.mubr.f32.vlgmr.msra.gmra.mrb[18].mxu1 %v10177_v60 }
 0x91a   : > { %9119 = vmatpush3.bf16.msra.mxu1 %v9100_v57  ;;  %8774 = vmatprep.mubr.msk.f32.mxu1 %vm9640_vm4, %v10673_v40 }
 0x91b   : > { %9120 = vmatprep.subr.bf16.mxu1 %v10672_v34 }
 0x91e   : > { %9122 = vmatpush3.bf16.msra.mxu1 %v9103_v41 }
 0x91f   : > { %9123 = vmatprep.subr.bf16.mxu1 %v10672_v34 }
 0x921   : > { %8775 = vmatmul.mubr.f32.vlgmr.msra.gmra.mrb[18].mxu1 %v10182_v13 }
 0x922   : > { %9125 = vmatpush3.bf16.msra.mxu1 %v9124_v19  ;;  %8785 = vmatprep.mubr.msk.f32.mxu1 %vm9640_vm4, %v10673_v40 }
 0x923   : > { %9126 = vmatprep.subr.bf16.mxu1 %v10672_v34 }
 0x926   : > { %9128 = vmatpush3.bf16.msra.mxu1 %v9127_v7 }
 0x927   : > { %9129 = vmatprep.subr.bf16.mxu1 %v10672_v34 }
 0x929   : > { %8786 = vmatmul.mubr.f32.vlgmr.msra.gmra.mrb[18].mxu1 %v10170_v53 }
 0x92a   : > { %9131 = vmatpush3.bf16.msra.mxu1 %v9100_v57  ;;  %8796 = vmatprep.mubr.msk.f32.mxu1 %vm9640_vm4, %v10673_v40 }
 0x92b   : > { %9132 = vmatprep.subr.bf16.mxu1 %v10672_v34 }
 0x92e   : > { %9134 = vmatpush3.bf16.msra.mxu1 %v9103_v41 }
 0x931   : > { %8797 = vmatmul.mubr.f32.vlgmr.msra.gmra.mrb[18].mxu1 %v10170_v53 }
 0xa04   : > { %v7397_v60 = vpop.f32.mrb[18].mxu1 }
 0xa05   : > { %v9170_v34 = vadd.f32 %v7397_v60, %v10224_v10  ;;  %v8798_v13 = vpop.f32.mrb[19].mxu1 }
 0xa07   : > { %7565 = vst [vmem:[%s9876_s24 + $0x3] sm:$0x1] %v9170_v34  ;;  %7403 = vst [vmem:[#allocation2] sm:$0x1] %v9170_v34 }
 0xa08   : > { %9539 = shalt.err (!%p9536_p3)
}
 0xa09   : > { %s9540_s24 = scalar_lea.hbm %s10529_s30, 64  ;;  %s9544_s11 = scalar_lea.hbm %s10700_s26, 512 }
 0xa0a   : > { %p9541_p8 = scmp.ne.s32.totalorder %s10529_s30, %s9540_s24  ;;  %p9545_p2 = scmp.lt.u32.totalorder %s10529_s30, %s10700_s26 }
 0xa0b   : > { %p9546_p6 = scmp.lt.u32.totalorder %s9544_s11, %s9540_s24  ;;  %p9548_p7 = scmp.lt.u32.totalorder %s9540_s24, %s10529_s30 }
 0xa0c   : > { %p9542_p13 = pnand %p9541_p8, %p10701_p11 }
 0xa0d   : > { %p9547_p4 = por %p9546_p6, %p9545_p2 }
 0xa0e   : > { %p9543_p9 = pneg %p9542_p13 }
 0xa0f   : > { %p9549_p12 = por %p9548_p7, %p9547_p4 }
 0xa11   : > { %p9550_p0 = pnand %p9549_p12, %p9543_p9 }
 0xa13   : > { %9553 = shalt.err (!%p9550_p0)
}
 0xa14   : > { %s9643_s9 = smov 16   ;;  %s9644_s18 = smov 32  }
 0xa15   : > { %s9645_s22 = smov 1  }
 0xa16   : > { %9377 = dma.vmem_to_hbm [thread:$0]  (%p10701_p11), %s10531_s27, 64, %s10529_s30, %s7405_s14, %s9643_s9, %s9644_s18, %s9645_s22  }
 0xa17 PF: > { %s10702_s25 = sld [smem:[#allocation14_spill]]  ;;  %s10703_s15 = sld [smem:[#allocation19_spill]] }
 0xa18   : > { %p9389_p1 = scmp.ge.s32.totalorder %s9628_s8, 2 }
 0xa1d   : > { %s7435_s20 = sand.u32 1, %s10702_s25   ;;  %p10704_p5 = scmp.ne.s32.totalorder %s10703_s15, 0 }
 0xa1e   : > { %s7436_s24 = scalar_lea.sflag [#allocation7], %s7435_s20 }
 0xa1f   : > { %p9384_p10 = pnand %p9389_p1, %p10704_p5 }
 0xa21   : > { %9595 = dma.done.wait (!%p9384_p10), %s7436_s24, 64  }
 0xa22   : > { %9597 = vsyncadd (!%p9384_p10), %s7436_s24, 4294967232  ;;  %s28_s8 = sadd.s32 1, %s9628_s8   ;;  %s10705_s19 = sld [smem:[#allocation20_spill]] }
 0xa23   : > { %p25_p3 = scmp.ge.s32.totalorder %s28_s8, 10   ;;  %s10706_s28 = sld [smem:[#allocation16_spill]] }
 0xa24   : > { %s10707_s10 = sld [smem:[#allocation17_spill]]  ;;  %s10708_s11 = smov %s9604_s12 }
 0xa25   : > { %s10709_s12 = smov %s9608_s13  ;;  %s10711_s14 = smov %s9620_s16 }
 0xa26   : > { %s10712_s15 = smov %s9624_s17  ;;  %27 = sbr.rel (!%p25_p3) target bundleno = 11 (0xb), region = 167 }
 0xa28   : > { %s10710_s13 = smov %s10705_s19 }
 0xa29   : > { %s10713_s16 = smov %s10706_s28 }
 0xa2a   : > { %s10714_s17 = smov %s10707_s10 }
 0xa2d   :  { %7441 = vsyncpa [#allocation6], 1 }
 0xa2e   :  { %7443 = vsyncpa [#allocation6 + $0x1], 1 }
 0xa2f   :  { %7444 = vsyncpa [#allocation9], 1 }
 0xa30   :  { %7445 = vsyncpa [#allocation7], 1 }
 0xa31   :  { %7447 = vsyncpa [#allocation7 + $0x1], 1 }

</bundles_post_ra>
